<compile_context>
chip_gen: v7x
topology: tpu7x:2x2x1
jax: 0.10.0
libtpu: 0.0.40
codegen_flags: <defaults>
</compile_context>

<pallas_src>
from math import sqrt, gcd

import jax
import jax.numpy as jnp
from jax.experimental import pallas as pl
from jax.experimental.pallas import tpu as pltpu


def siren_kernel(x_ref, w_ref, b_ref, o_ref):
    # x_ref : (tile, k_in)    VMEM
    # w_ref : (k_in, k_out)   VMEM  (w0 already folded in, block-diagonal if packed)
    # b_ref : (1, k_out)      VMEM  (w0 already folded in)
    # o_ref : (tile, k_out)   VMEM
    pre = jnp.dot(
        x_ref[...],
        w_ref[...],
        preferred_element_type=jnp.float32,
        precision=jax.lax.Precision.HIGHEST,
    )
    o_ref[...] = jnp.sin(pre + b_ref[...]).astype(o_ref.dtype)


def _round_up(v, m):
    return ((v + m - 1) // m) * m


def _choose_tile(rows, k_in, k_out, *, pipeline_budget=16 << 20, max_tile=16384):
    """Row tile (multiple of 8).

    Capped so double-buffered in+out tiles stay within `pipeline_budget`,
    and sized to give >= 4 grid steps when possible (>= 2 per v7x TensorCore).
    """
    bytes_per_row = 4 * (k_in + k_out)            # f32 in + out
    cap = (pipeline_budget // (2 * bytes_per_row)) // 8 * 8
    cap = max(8, min(cap, max_tile))
    target = _round_up(pl.cdiv(rows, 4), 8)       # aim for >= 4 grid steps
    return max(8, min(cap, target))


def siren_layer(x, weight, bias, w0=30.0):
    """out = sin(w0 * (x @ weight.T + bias)).  x: (..., dim_in) f32."""
    orig_shape = x.shape
    dim_in = orig_shape[-1]
    dim_out, dim_in_w = weight.shape
    assert dim_in_w == dim_in

    x2 = x.reshape(-1, dim_in)
    N = x2.shape[0]
    dtype = x2.dtype

    # Fold w0 into the affine parameters (one-time O(dim_in*dim_out) cost).
    wt = (w0 * weight.T).astype(dtype)            # (dim_in, dim_out)
    if bias is None:
        b = jnp.zeros((dim_out,), dtype)
    else:
        b = (w0 * bias).astype(dtype)

    # Lane-dense packing: smallest p such that (p * dim_out) % 128 == 0.
    p = 128 // gcd(dim_out, 128)
    pack = p if (p > 1 and p * max(dim_in, dim_out) <= 1024) else 1

    if pack > 1:
        pad_n = (-N) % pack
        if pad_n:
            x2 = jnp.concatenate([x2, jnp.zeros((pad_n, dim_in), dtype)], axis=0)
        rows = (N + pad_n) // pack
        x_k = x2.reshape(rows, pack * dim_in)                 # contiguous -> free
        w_k = jnp.kron(jnp.eye(pack, dtype=dtype), wt)        # block-diagonal
        b_k = jnp.tile(b, pack).reshape(1, pack * dim_out)
    else:
        pad_n = 0
        rows = N
        x_k = x2
        w_k = wt
        b_k = b.reshape(1, dim_out)

    k_in = x_k.shape[1]
    k_out = w_k.shape[1]

    tile = _choose_tile(rows, k_in, k_out)
    grid = (pl.cdiv(rows, tile),)                 # Pallas handles the ragged last block

    out_k = pl.pallas_call(
        siren_kernel,
        out_shape=jax.ShapeDtypeStruct((rows, k_out), dtype),
        grid_spec=pltpu.PrefetchScalarGridSpec(
            num_scalar_prefetch=0,
            grid=grid,
            in_specs=[
                pl.BlockSpec((tile, k_in), lambda i: (i, 0)),
                pl.BlockSpec((k_in, k_out), lambda i: (0, 0)),   # resident weights
                pl.BlockSpec((1, k_out), lambda i: (0, 0)),      # resident bias
            ],
            out_specs=pl.BlockSpec((tile, k_out), lambda i: (i, 0)),
        ),
        compiler_params=pltpu.CompilerParams(
            dimension_semantics=("parallel",),
            vmem_limit_bytes=40 * 1024 * 1024,
        ),
    )(x_k, w_k, b_k)

    out = out_k.reshape(rows * pack, dim_out)
    if pad_n:
        out = out[:N]
    return out.reshape(*orig_shape[:-1], dim_out)


if __name__ == "__main__":
    key = jax.random.PRNGKey(0)
    w0, c = 30.0, 6.0
    k1, k2, k3, k4, k5, k6 = jax.random.split(key, 6)

    # Case 1: hidden SIREN layer (dim_in == dim_out == 32), small batch of coords.
    N1, d_in1, d_out1 = 1024, 32, 32
    w_std1 = sqrt(c / d_in1) / w0
    x1 = jax.random.normal(k1, (N1, d_in1), dtype=jnp.float32)
    W1 = jax.random.uniform(k2, (d_out1, d_in1), jnp.float32, -w_std1, w_std1)
    b1 = jax.random.uniform(k3, (d_out1,), jnp.float32, -w_std1, w_std1)

    out1 = jax.block_until_ready(siren_layer(x1, W1, b1, w0))
    ref1 = jnp.sin(w0 * (jnp.dot(x1, W1.T, precision="highest") + b1))
    assert out1.shape == (N1, d_out1)
    err1 = float(jnp.max(jnp.abs(out1 - ref1)))
    assert jnp.allclose(out1, ref1, atol=1e-4, rtol=1e-4), err1

    # Case 2: first layer (is_first=True), ragged row count, dim_out = 48
    # (exercises the generalized packing and the cdiv ragged last block).
    N2, d_in2, d_out2 = 1000, 3, 48
    w_std2 = 1.0 / d_in2
    x2 = jax.random.uniform(k4, (N2, d_in2), jnp.float32, -1.0, 1.0)
    W2 = jax.random.uniform(k5, (d_out2, d_in2), jnp.float32, -w_std2, w_std2)
    b2 = jax.random.uniform(k6, (d_out2,), jnp.float32, -w_std2, w_std2)

    out2 = jax.block_until_ready(siren_layer(x2, W2, b2, w0))
    ref2 = jnp.sin(w0 * (jnp.dot(x2, W2.T, precision="highest") + b2))
    assert out2.shape == (N2, d_out2)
    err2 = float(jnp.max(jnp.abs(out2 - ref2)))
    assert jnp.allclose(out2, ref2, atol=1e-4, rtol=1e-4), err2

    print("KERNEL_OK")
</pallas_src>

<mosaic_0001>
module attributes {stable_mosaic.version = 11 : i64} {
  func.func @siren_kernel(%arg0: i32, %arg1: memref<64x128xf32, #tpu.memory_space<vmem>>, %arg2: memref<128x128xf32, #tpu.memory_space<vmem>>, %arg3: memref<1x128xf32, #tpu.memory_space<vmem>>, %arg4: memref<64x128xf32, #tpu.memory_space<vmem>>) attributes {dimension_semantics = [#tpu.dimension_semantics<parallel>], iteration_bounds = array<i64: 4>, scalar_prefetch = 0 : i64, scratch_operands = 0 : i64, tpu.core_type = #tpu.core_type<tc>, window_params = [{transform_indices = @transform_0, window_bounds = array<i64: 64, 128>}, {pipeline_mode = #tpu.pipeline_mode<synchronous>, transform_indices = @transform_1, window_bounds = array<i64: 128, 128>}, {pipeline_mode = #tpu.pipeline_mode<synchronous>, transform_indices = @transform_2, window_bounds = array<i64: 1, 128>}, {transform_indices = @transform_3, window_bounds = array<i64: 64, 128>}]} {
    %c0 = arith.constant 0 : index
    %c0_0 = arith.constant 0 : index
    %0 = vector.load %arg1[%c0, %c0_0] : memref<64x128xf32, #tpu.memory_space<vmem>>, vector<64x128xf32>
    %c0_1 = arith.constant 0 : index
    %c0_2 = arith.constant 0 : index
    %1 = vector.load %arg2[%c0_1, %c0_2] : memref<128x128xf32, #tpu.memory_space<vmem>>, vector<128x128xf32>
    %cst = arith.constant dense<0.000000e+00> : vector<64x128xf32>
    %2 = tpu.matmul %0, %1, %cst {dimension_numbers = #tpu.dot_dimension_numbers<[1], [0], [0], [1], [0, 0, 1, 1], [], []>, precision = #tpu.contract_precision<fp32>} : vector<64x128xf32>, vector<128x128xf32>, vector<64x128xf32> -> vector<64x128xf32>
    %c0_3 = arith.constant 0 : index
    %c0_4 = arith.constant 0 : index
    %3 = vector.load %arg3[%c0_3, %c0_4] : memref<1x128xf32, #tpu.memory_space<vmem>>, vector<1x128xf32>
    %4 = vector.broadcast %3 : vector<1x128xf32> to vector<64x128xf32>
    %5 = arith.addf %2, %4 : vector<64x128xf32>
    %6 = math.sin %5 : vector<64x128xf32>
    %c0_5 = arith.constant 0 : index
    %c0_6 = arith.constant 0 : index
    %7 = vector.load %arg4[%c0_5, %c0_6] : memref<64x128xf32, #tpu.memory_space<vmem>>, vector<64x128xf32>
    tpu.vector_store %arg4[%c0_5, %c0_6], %6 {strides = array<i32>} : memref<64x128xf32, #tpu.memory_space<vmem>>, vector<64x128xf32>,
    return
  }
  func.func @transform_0(%arg0: i32) -> (i32, i32) {
    %c0_i32 = arith.constant 0 : i32
    %c0_i32_0 = arith.constant 0 : i32
    return %arg0, %c0_i32 : i32, i32
  }
  func.func @transform_1(%arg0: i32) -> (i32, i32) {
    %c0_i32 = arith.constant 0 : i32
    %c0_i32_0 = arith.constant 0 : i32
    %c0_i32_1 = arith.constant 0 : i32
    return %c0_i32, %c0_i32_0 : i32, i32
  }
  func.func @transform_2(%arg0: i32) -> (i32, i32) {
    %c0_i32 = arith.constant 0 : i32
    %c0_i32_0 = arith.constant 0 : i32
    %c0_i32_1 = arith.constant 0 : i32
    return %c0_i32, %c0_i32_0 : i32, i32
  }
  func.func @transform_3(%arg0: i32) -> (i32, i32) {
    %c0_i32 = arith.constant 0 : i32
    %c0_i32_0 = arith.constant 0 : i32
    return %arg0, %c0_i32 : i32, i32
  }
}

</mosaic_0001>

<bundles_post_ra>
// kernel: tpu_custom_call.1
= control target key start
LH: loop header
LB: loop body
LE: loop exit
PB: predicated region body
PF: predicated region fallthrough
CT: control target
= control target key end

     0   :  { %8 = vsyncpa [#allocation3], 0  ;;  %s4313_s0 = inlined_call_operand.hbm [shape: f32[256,128], index: 0, kind: input, shape index: {}]   ;;  %s4314_s1 = inlined_call_operand.hbm [shape: f32[128,128], index: 1, kind: input, shape index: {}]   ;;  %s4315_s2 = inlined_call_operand.vmem [shape: f32[1,128], index: 2, kind: input, shape index: {}]   ;;  %s4316_s3 = inlined_call_operand.hbm [shape: f32[256,128], index: 3, kind: output, shape index: {}]  }
   0x1   :  { %10 = vsyncpa [#allocation3 + $0x1], 0 }
   0x2   :  { %11 = vsyncpa [#allocation6], 0 }
   0x3   :  { %12 = vsyncpa [#allocation4], 0 }
   0x4   :  { %14 = vsyncpa [#allocation4 + $0x1], 0  ;;  %s3109_s12 = smov 0   ;;  %s3111_s13 = smov 0  }
   0x5   :  { %s3113_s14 = smov 0   ;;  %s3115_s15 = smov 0  }
   0x6 LB: > { %s3130_s16 = sadd.s32 4294967295, %s3074_s15   ;;  %s2116_s17 = sadd.s32 4294967294, %s3074_s15   ;;  %s3074_s15 = sphi %s3115_s15, %s4392_s15   ;;  %s3070_s14 = sphi %s3113_s14, %s4391_s14   ;;  %s3066_s13 = sphi %s3111_s13, %s4390_s13   ;;  %s3062_s12 = sphi %s3109_s12, %s4389_s12  }
   0x7   : > { %p40_p0 = scmp.ne.s32.totalorder %s3066_s13, %s3062_s12  ;;  %p4317_p1 = scmp.eq.s32.totalorder %s3130_s16, 0 }
   0x8   : > { %p112_p3 = scmp.eq.s32.totalorder %s2116_s17, 3  ;;  %p2117_p5 = scmp.ge.s32.totalorder %s3074_s15, 1 }
   0x9   : > { %p3139_p4 = por %p4317_p1, %p40_p0  ;;  %p119_p7 = scmp.lt.s32.totalorder %s3074_s15, 5 }
   0xa   : > { %p3144_p6 = por %p112_p3, %p40_p0  ;;  %s3076_s21 = smov [#allocation5]  }
   0xb   : > { %s4339_s18 = scalar_select %p3139_p4, 1, 0 }
   0xc   : > { %s4340_s19 = scalar_select %p3144_p6, 1, 0 }
   0xd   : > { %p3149_p8 = pnand %p2117_p5, %p119_p7  ;;  %s131_s22 = sshll.u32 %s3076_s21, 4  ;;  %s132_s22 = int_to_ptr.vmem [resolvable:$true] %s131_s22 }
   0xe   : > { %s3162_s24 = sadd.s32 1, %s3074_s15   ;;  %s27_s25 = sadd.s32 1, %s3070_s14 }
   0xf   : > { %s4341_s20 = scalar_select %p3149_p8, 1, 0 }
  0x10   : > { %p2855_p9 = pneg %p3149_p8  ;;  %s24_s26 = ssub.s32 %s3074_s15, %s3162_s24 }
  0x11   : > { %s2946_s29 = scalar_lea.hbm %s4314_s1, 2048 }
  0x12   : > { %p3157_p10 = pnand %p2855_p9, %p4317_p1  ;;  %p2947_p11 = scmp.ne.s32.totalorder %s4314_s1, %s2946_s29 }
  0x13   : > { %p2953_p3 = scmp.lt.u32.totalorder %s2946_s29, %s4314_s1 }
  0x14   : > { %p2948_p12 = pneg %p3157_p10 }
  0x16   : > { %p2949_p13 = pnand %p2948_p12, %p2947_p11 }
  0x18   : > { %p2950_p0 = pneg %p2949_p13 }
  0x1a   : > { %p2955_p5 = pnand %p2953_p3, %p2950_p0 }
  0x1c   : > { %2958 = shalt.err (!%p2955_p5)
}
  0x1d   : > { %s2959_s7 = scalar_lea.vmem %s132_s22, 2048  ;;  %p2967_p2 = scmp.lt.s32.totalorder %s132_s22, %s132_s22 }
  0x1e   : > { %p2960_p7 = scmp.ne.s32.totalorder %s132_s22, %s2959_s7  ;;  %p2968_p6 = scmp.lt.s32.totalorder %s2959_s7, %s2959_s7 }
  0x20   : > { %p2962_p9 = pnand %p2960_p7, %p2948_p12  ;;  %p2969_p4 = por %p2968_p6, %p2967_p2 }
  0x22   : > { %p2963_p1 = pneg %p2962_p9 }
  0x24   : > { %p2970_p8 = pnand %p2969_p4, %p2963_p1 }
  0x26   : > { %2973 = shalt.err (!%p2970_p8)
}
  0x27   : > { %s3077_s8 = smov 128   ;;  %s3078_s9 = smov 8  }
  0x28   : > { %2858 = dma.hbm_to_vmem [thread:$0]  (!%p3157_p10), %s4314_s1, 2048, %s132_s22, [#allocation6], %s3077_s8, %s3077_s8, %s3078_s9  }
  0x29   : > { %p25_p1 = scmp.eq.s32.totalorder %s24_s26, 0  ;;  %p34_p2 = scmp.ne.s32.totalorder %s3070_s14, %s3066_s13 }
  0x2a   : > { %p35_p4 = scmp.eq.s32.totalorder %s3074_s15, 0  ;;  %p2868_p6 = scmp.lt.s32.totalorder %s3074_s15, 4 }
  0x2b   : > { %s3191_s17 = scalar_select %p25_p1, %s3070_s14, %s27_s25  }
  0x2c   : > { %p36_p8 = por %p35_p4, %p34_p2  ;;  %p4343_p11 = scmp.eq.s32.totalorder %s3130_s16, 3 }
  0x2d   : > { %s148_s23 = sand.u32 1, %s3070_s14   ;;  %s2165_s27 = sshll.u32 %s3074_s15, 10 }
  0x2e   : > { %p3195_p12 = por %p4343_p11, %p34_p2  ;;  %s2120_s28 = sshll.u32 %s148_s23, 6 }
  0x2f   : > { %s3204_s4 = scalar_lea.hbm %s4313_s0, %s2165_s27  ;;  %s152_s22 = scalar_lea.vmem [#allocation2], %s2120_s28 }
  0x30   : > { %s159_s25 = sshll.u32 %s152_s22, 4  ;;  %p3206_p10 = pnand %p2868_p6, %p36_p8  ;;  %s3210_s25 = int_to_ptr.vmem [resolvable:$true] %s159_s25 }
  0x31   : > { %s3212_s5 = scalar_lea.sflag [#allocation3], %s148_s23  ;;  %s2974_s6 = scalar_lea.hbm %s3204_s4, 1024 }
  0x32   : > { %p2975_p13 = scmp.ne.s32.totalorder %s3204_s4, %s2974_s6  ;;  %p2976_p0 = pneg %p3206_p10 }
  0x33   : > { %s2979_s11 = scalar_lea.hbm %s4313_s0, 4096  ;;  %p2980_p7 = scmp.lt.u32.totalorder %s3204_s4, %s4313_s0 }
  0x34   : > { %p2977_p3 = pnand %p2976_p0, %p2975_p13  ;;  %p2981_p9 = scmp.lt.u32.totalorder %s2979_s11, %s2974_s6 }
  0x35   : > { %p2983_p2 = scmp.lt.u32.totalorder %s2974_s6, %s3204_s4 }
  0x36   : > { %p2978_p5 = pneg %p2977_p3  ;;  %p2982_p1 = por %p2981_p9, %p2980_p7 }
  0x38   : > { %p2984_p4 = por %p2983_p2, %p2982_p1 }
  0x3a   : > { %p2985_p6 = pnand %p2984_p4, %p2978_p5 }
  0x3c   : > { %2988 = shalt.err (!%p2985_p6)
}
  0x3d   : > { %s2989_s23 = scalar_lea.vmem %s3210_s25, 1024  ;;  %s3079_s29 = smov [#allocation2]  }
  0x3e   : > { %p2990_p8 = scmp.ne.s32.totalorder %s3210_s25, %s2989_s23  ;;  %s2994_s30 = sshll.u32 %s3079_s29, 4  ;;  %s2995_s30 = int_to_ptr.vmem [resolvable:$false] %s2994_s30 }
  0x3f   : > { %s2996_s22 = scalar_lea.vmem %s2995_s30, 2048  ;;  %p2997_p3 = scmp.lt.s32.totalorder %s3210_s25, %s2995_s30 }
  0x40   : > { %p2992_p11 = pnand %p2990_p8, %p2976_p0  ;;  %p2998_p7 = scmp.lt.s32.totalorder %s2996_s22, %s2989_s23 }
  0x42   : > { %p2993_p13 = pneg %p2992_p11  ;;  %p2999_p9 = por %p2998_p7, %p2997_p3 }
  0x44   : > { %p3000_p1 = pnand %p2999_p9, %p2993_p13 }
  0x46   : > { %3003 = shalt.err (!%p3000_p1)
}
  0x47   : > { %2862 = dma.hbm_to_vmem [thread:$0]  (!%p3206_p10), %s3204_s4, 1024, %s3210_s25, %s3212_s5, %s3077_s8, %s3077_s8, %s3078_s9  }
  0x48   : > { %p4346_p0 = scmp.ne.s32.totalorder %s4341_s20, 0 }
  0x4a   : > { %171 = sbr.rel (%p4346_p0) target bundleno = 657 (0x291), region = 32 }
  0x51   : > { %s3246_s6 = sand.u32 1, %s3066_s13   ;;  %p4347_p5 = scmp.ne.s32.totalorder %s4339_s18, 0 }
  0x52   : > { %s2124_s7 = sshll.u32 %s3246_s6, 6  ;;  %s174_s10 = scalar_lea.sflag [#allocation3], %s3246_s6 }
  0x53   : > { %s3252_s26 = scalar_lea.vmem [#allocation2], %s2124_s7 }
  0x54   : > { %3049 = dma.done.wait (%p4347_p5), %s174_s10, 1024  }
  0x55   : > { %3051 = vsyncadd (%p4347_p5), %s174_s10, 4294966272  ;;  %p4348_p10 = scmp.eq.s32.totalorder %s3130_s16, 0 }
  0x57   : > { %3053 = dma.done.wait (%p4348_p10), [#allocation6], 2048   ;;  %p4349_p2 = pmov %p4348_p10 }
  0x58   : > { %v214_v0 = vld [vmem:[#allocation5] sm:$0xff]  ;;  %v215_v1 = vld [vmem:[#allocation5 + $0x8] sm:$0xff]  ;;  %v216_v2 = vld [vmem:[#allocation5 + $0x10] sm:$0xff]  ;;  %s3919_s8 = scalar_lea.vmem [#allocation7], %s2124_s7  ;;  %s2166_s9 = sshll.u32 %s3130_s16, 10 }
  0x59   : > { %3055 = vsyncadd (%p4349_p2), [#allocation6], 4294965248  ;;  %v238_v3 = vand.u32 4294901760, %v214_v0  ;;  %v241_v4 = vand.u32 4294901760, %v215_v1  ;;  %v217_v5 = vld [vmem:[#allocation5 + $0x18] sm:$0xff]  ;;  %v244_v6 = vand.u32 4294901760, %v216_v2  ;;  %s4266_s11 = scalar_lea.hbm %s4316_s3, %s2166_s9 }
  0x5a   : > { %v3262_v7 = vld [vmem:[#allocation5 + $0x20] sm:$0xff]  ;;  %v3264_v8 = vld [vmem:[#allocation5 + $0x28] sm:$0xff]  ;;  %v247_v9 = vand.u32 4294901760, %v217_v5  ;;  %v3272_v14 = vld [vmem:[#allocation5 + $0x30] sm:$0xff]  ;;  %s2033_s4 = sshll.u32 %s3919_s8, 4  ;;  %s2020_s16 = scalar_lea.sflag [#allocation4], %s3246_s6  ;;  %s4268_s4 = int_to_ptr.vmem [resolvable:$true] %s2033_s4 }
  0x5b   : > { %v3266_v10 = vpack.c.bf16 %v241_v4, %v238_v3  ;;  %v250_v11 = vand.u32 4294901760, %v3262_v7  ;;  %v253_v12 = vand.u32 4294901760, %v3264_v8  ;;  %v3274_v15 = vld [vmem:[#allocation5 + $0x38] sm:$0xff]  ;;  %v206_v16 = vld [vmem:[%s3252_s26] sm:$0xff]  ;;  %v256_v19 = vand.u32 4294901760, %v3272_v14  ;;  %v3293_v22 = vld [vmem:[#allocation5 + $0x48] sm:$0xff] }
  0x5c   : > { %v3270_v13 = vpack.c.bf16 %v247_v9, %v244_v6  ;;  %v3281_v17 = vand.u32 4294901760, %v206_v16  ;;  %v259_v20 = vand.u32 4294901760, %v3274_v15  ;;  %v3291_v21 = vld [vmem:[#allocation5 + $0x40] sm:$0xff]  ;;  %v207_v25 = vld [vmem:[%s3252_s26 + $0x8] sm:$0xff]  ;;  %v265_v28 = vand.u32 4294901760, %v3293_v22  ;;  %v3312_v29 = vld [vmem:[#allocation5 + $0x50] sm:$0xff] }
  0x5d   : > { %2576 = vmatprep.subr.bf16.mxu1 %v3266_v10  ;;  %2672 = vmatprep.subr.bf16.mxu0 %v3266_v10  ;;  %v3287_v18 = vpack.c.bf16 %v253_v12, %v250_v11  ;;  %v262_v27 = vand.u32 4294901760, %v3291_v21  ;;  %v3314_v30 = vld [vmem:[#allocation5 + $0x58] sm:$0xff]  ;;  %v3317_v32 = vand.u32 4294901760, %v207_v25  ;;  %v3321_v34 = vsub.f32 %v214_v0, %v238_v3  ;;  %v3333_v38 = vld [vmem:[#allocation5 + $0x60] sm:$0xff]  ;;  %v3335_v39 = vld [vmem:[#allocation5 + $0x68] sm:$0xff]  ;;  %s3004_s27 = scalar_lea.vmem %s4268_s4, 1024 }
  0x5e   : > { %2578 = vmatpush3.bf16.msra.mxu1 %v3266_v10  ;;  %2674 = vmatpush3.bf16.msra.mxu0 %v3266_v10  ;;  %v3296_v23 = vsub.f32 %v206_v16, %v3281_v17  ;;  %v3308_v26 = vpack.c.bf16 %v259_v20, %v256_v19  ;;  %v268_v36 = vand.u32 4294901760, %v3312_v29  ;;  %v271_v37 = vand.u32 4294901760, %v3314_v30  ;;  %v3339_v41 = vld [vmem:[#allocation5 + $0x70] sm:$0xff]  ;;  %v3341_v42 = vld [vmem:[#allocation5 + $0x78] sm:$0xff]  ;;  %v210_v59 = vld [vmem:[%s3252_s26 + $0x20] sm:$0xff]  ;;  %p3005_p4 = scmp.ne.s32.totalorder %s4268_s4, %s3004_s27  ;;  %s3086_s28 = smov [#allocation7]  }
  0x5f   : > { %2580 = vmatprep.subr.bf16.mxu1 %v3270_v13  ;;  %2676 = vmatprep.subr.bf16.mxu0 %v3270_v13  ;;  %v3329_v35 = vpack.c.bf16 %v265_v28, %v262_v27  ;;  %v3337_v40 = vsub.f32 %v215_v1, %v241_v4  ;;  %v3344_v43 = vsub.f32 %v207_v25, %v3317_v32  ;;  %v208_v45 = vld [vmem:[%s3252_s26 + $0x10] sm:$0xff]  ;;  %v4323_v46 = vand.u32 4294901760, %v3333_v38  ;;  %v209_v56 = vld [vmem:[%s3252_s26 + $0x18] sm:$0xff]  ;;  %s3008_s23 = sshll.u32 %s3086_s28, 4  ;;  %s3009_s23 = int_to_ptr.vmem [resolvable:$false] %s3008_s23 }
  0x60   : > { %4350 = vst [vmem:[#allocation11_spill] sm:$0xff] %v3296_v23  ;;  %v320_v24 = vand.u32 4294901760, %v3296_v23  ;;  %v3346_v44 = vsub.f32 %v216_v2, %v244_v6  ;;  %v4322_v47 = vand.u32 4294901760, %v3335_v39  ;;  %v401_v48 = vand.u32 4294901760, %v3321_v34  ;;  %v211_v6 = vld [vmem:[%s3252_s26 + $0x28] sm:$0xff]  ;;  %p3006_p6 = pnand %p3005_p4, %p3195_p12  ;;  %s3010_s29 = scalar_lea.vmem %s3009_s23, 2048 }
  0x61   : > { %4351 = vst [vmem:[#allocation12_spill] sm:$0xff] %v3329_v35  ;;  %v3354_v49 = vsub.f32 %v217_v5, %v247_v9  ;;  %v3362_v50 = vpack.c.bf16 %v271_v37, %v268_v36  ;;  %v408_v51 = vand.u32 4294901760, %v3337_v40  ;;  %v3366_v52 = vsub.f32 %v3262_v7, %v250_v11  ;;  %p3011_p11 = scmp.lt.s32.totalorder %s4268_s4, %s3009_s23  ;;  %p3012_p13 = scmp.lt.s32.totalorder %s3010_s29, %s3004_s27 }
  0x62   : > { %2582 = vmatpush3.bf16.msra.mxu1 %v3270_v13  ;;  %2678 = vmatpush3.bf16.msra.mxu0 %v3270_v13  ;;  %v321_v31 = vsub.f32 %v3296_v23, %v320_v24  ;;  %v4321_v53 = vand.u32 4294901760, %v3339_v41  ;;  %v4320_v54 = vand.u32 4294901760, %v3341_v42  ;;  %v3370_v55 = vand.u32 4294901760, %v208_v45  ;;  %p3007_p8 = pneg %p3006_p6 }
  0x63   : > { %2584 = vmatprep.subr.bf16.mxu1 %v3287_v18  ;;  %2680 = vmatprep.subr.bf16.mxu0 %v3287_v18  ;;  %4352 = vst [vmem:[#allocation13_spill] sm:$0xff] %v3362_v50  ;;  %v4324_v57 = vand.u32 4294901760, %v3344_v43  ;;  %v415_v58 = vand.u32 4294901760, %v3346_v44  ;;  %v3382_v60 = vpack.c.bf16 %v4322_v47, %v4323_v46  ;;  %v402_v61 = vsub.f32 %v3321_v34, %v401_v48  ;;  %p3013_p3 = por %p3012_p13, %p3011_p11 }
  0x64   : > { %2475 = vmatprep.mubr.f32.mxu0 %v320_v24  ;;  %v322_v33 = vand.u32 4294901760, %v321_v31  ;;  %v422_v62 = vand.u32 4294901760, %v3354_v49  ;;  %v409_v63 = vsub.f32 %v3337_v40, %v408_v51  ;;  %v4325_v0 = vand.u32 4294901760, %v3366_v52 }
  0x65   : > { %4353 = vst [vmem:[#allocation14_spill] sm:$0xff] %v3382_v60  ;;  %v3393_v1 = vsub.f32 %v3264_v8, %v253_v12  ;;  %v3395_v2 = vand.u32 4294901760, %v209_v56  ;;  %v3401_v3 = vpack.c.bf16 %v4320_v54, %v4321_v53  ;;  %v3404_v4 = vsub.f32 %v208_v45, %v3370_v55  ;;  %v212_v12 = vld [vmem:[%s3252_s26 + $0x30] sm:$0xff]  ;;  %p3014_p7 = pnand %p3013_p3, %p3007_p8 }
  0x66   : > { %2586 = vmatpush3.bf16.msra.mxu1 %v3287_v18  ;;  %2682 = vmatpush3.bf16.msra.mxu0 %v3287_v18  ;;  %v3406_v5 = vand.u32 4294901760, %v210_v59  ;;  %v3409_v7 = vpack.c.bf16 %v408_v51, %v401_v48  ;;  %v331_v8 = vsub.f32 %v3344_v43, %v4324_v57  ;;  %v416_v9 = vsub.f32 %v3346_v44, %v415_v58 }
  0x67   : > { %2588 = vmatprep.subr.bf16.mxu1 %v3308_v26  ;;  %2684 = vmatprep.subr.bf16.mxu0 %v3308_v26  ;;  %4354 = vst [vmem:[#allocation15_spill] sm:$0xff] %v3401_v3  ;;  %4355 = vst [vmem:[#allocation16_spill] sm:$0xff] %v3404_v4  ;;  %v3418_v11 = vsub.f32 %v3272_v14, %v256_v19  ;;  %v403_v16 = vand.u32 4294901760, %v402_v61  ;;  %v423_v24 = vsub.f32 %v3354_v49, %v422_v62 }
  0x68   : > { %2343 = vmatprep.mubr.f32.mxu1 %v322_v33  ;;  %v3427_v25 = vsub.f32 %v3274_v15, %v259_v20  ;;  %v3430_v31 = vsub.f32 %v209_v56, %v3395_v2  ;;  %v410_v14 = vand.u32 4294901760, %v409_v63  ;;  %v3437_v19 = vsub.f32 %v3366_v52, %v4325_v0 }
  0x69   : > { %v436_v33 = vand.u32 4294901760, %v3393_v1  ;;  %v3440_v45 = vand.u32 4294901760, %v211_v6  ;;  %v3445_v15 = vsub.f32 %v3291_v21, %v262_v27  ;;  %v340_v20 = vand.u32 4294901760, %v3404_v4 }
  0x6a   : > { %2590 = vmatpush3.bf16.msra.mxu1 %v3308_v26  ;;  %2686 = vmatpush3.bf16.msra.mxu0 %v3308_v26  ;;  %4356 = vst [vmem:[#allocation17_spill] sm:$0xff] %v3430_v31  ;;  %v3449_v48 = vsub.f32 %v210_v59, %v3406_v5  ;;  %v3451_v51 = vand.u32 4294901760, %v212_v12  ;;  %v3453_v56 = vpack.c.bf16 %v422_v62, %v415_v58  ;;  %v443_v61 = vand.u32 4294901760, %v3418_v11  ;;  %v213_v62 = vld [vmem:[%s3252_s26 + $0x38] sm:$0xff] }
  0x6b   : > { %2592 = vmatprep.subr.bf16.mxu1 %v3329_v35  ;;  %2688 = vmatprep.subr.bf16.mxu0 %v3329_v35  ;;  %v350_v63 = vand.u32 4294901760, %v3430_v31  ;;  %v3458_v54 = vsub.f32 %v211_v6, %v3440_v45  ;;  %v332_v21 = vand.u32 4294901760, %v331_v8  ;;  %v417_v27 = vand.u32 4294901760, %v416_v9 }
  0x6c   : > { %4357 = vst [vmem:[#allocation18_spill] sm:$0xff] %v3449_v48  ;;  %v450_v59 = vand.u32 4294901760, %v3427_v25  ;;  %v3466_v58 = vsub.f32 %v3293_v22, %v265_v28  ;;  %v2607_v6 = vpack.c.bf16 %v410_v14, %v403_v16  ;;  %v424_v53 = vand.u32 4294901760, %v423_v24 }
  0x6d   : > { %4358 = vst [vmem:[#allocation19_spill] sm:$0xff] %v3458_v54  ;;  %v431_v47 = vand.u32 4294901760, %v3437_v19  ;;  %v437_v46 = vsub.f32 %v3393_v1, %v436_v33  ;;  %v341_v9 = vsub.f32 %v3404_v4, %v340_v20  ;;  %v360_v57 = vand.u32 4294901760, %v3449_v48 }
  0x6e   : > { %2594 = vmatpush3.bf16.msra.mxu1 %v3329_v35  ;;  %2690 = vmatpush3.bf16.msra.mxu0 %v3329_v35  ;;  %v3477_v22 = vsub.f32 %v212_v12, %v3451_v51  ;;  %v444_v28 = vsub.f32 %v3418_v11, %v443_v61  ;;  %v351_v0 = vsub.f32 %v3430_v31, %v350_v63  ;;  %v370_v16 = vand.u32 4294901760, %v3458_v54 }
  0x6f   : > { %2596 = vmatprep.subr.bf16.mxu1 %v3362_v50  ;;  %2692 = vmatprep.subr.bf16.mxu0 %v3362_v50  ;;  %v3482_v24 = vand.u32 4294901760, %v213_v62  ;;  %v451_v14 = vsub.f32 %v3427_v25, %v450_v59  ;;  %v464_v19 = vand.u32 4294901760, %v3466_v58  ;;  %v3491_v12 = vsub.f32 %v3312_v29, %v268_v36 }
  0x70   : > { %v3496_v8 = vsub.f32 %v3314_v30, %v271_v37  ;;  %v2611_v31 = vpack.c.bf16 %v424_v53, %v417_v27  ;;  %v438_v4 = vand.u32 4294901760, %v437_v46  ;;  %v4360_v23 = vand.u32 4294901760, %v3445_v15 }
  0x71   : > { %v342_v36 = vand.u32 4294901760, %v341_v9  ;;  %v361_v35 = vsub.f32 %v3449_v48, %v360_v57  ;;  %v380_v30 = vand.u32 4294901760, %v3477_v22  ;;  %v4361_v37 = vand.u32 4294901760, %v3344_v43 }
  0x72   : > { %2598 = vmatpush3.bf16.msra.mxu1 %v3362_v50  ;;  %2694 = vmatpush3.bf16.msra.mxu0 %v3362_v50  ;;  %v3502_v50 = vsub.f32 %v213_v62, %v3482_v24  ;;  %v458_v29 = vsub.f32 %v3445_v15, %v4360_v23  ;;  %v445_v46 = vand.u32 4294901760, %v444_v28  ;;  %v352_v53 = vand.u32 4294901760, %v351_v0 }
  0x73   : > { %2600 = vmatprep.subr.bf16.mxu1 %v3382_v60  ;;  %2696 = vmatprep.subr.bf16.mxu0 %v3382_v60  ;;  %v452_v27 = vand.u32 4294901760, %v451_v14  ;;  %v465_v23 = vsub.f32 %v3466_v58, %v464_v19  ;;  %v471_v62 = vand.u32 4294901760, %v3491_v12  ;;  %v478_v9 = vand.u32 4294901760, %v3496_v8 }
  0x74   : > { %v4362_v0 = vand.u32 4294901760, %v3333_v38  ;;  %v362_v14 = vand.u32 4294901760, %v361_v35  ;;  %v459_v48 = vand.u32 4294901760, %v458_v29 }
  0x76   : > { %2602 = vmatpush3.bf16.msra.mxu1 %v3382_v60  ;;  %2698 = vmatpush3.bf16.msra.mxu0 %v3382_v60  ;;  %v3521_v28 = vsub.f32 %v3333_v38, %v4362_v0  ;;  %v2619_v38 = vpack.c.bf16 %v452_v27, %v445_v46  ;;  %v466_v0 = vand.u32 4294901760, %v465_v23 }
  0x77   : > { %2604 = vmatprep.subr.bf16.mxu1 %v3401_v3  ;;  %2700 = vmatprep.subr.bf16.mxu0 %v3401_v3 }
  0x78   : > { %v485_v35 = vand.u32 4294901760, %v3521_v28  ;;  %v2623_v46 = vpack.c.bf16 %v466_v0, %v459_v48  ;;  %v2723_v48 = vpack.c.bf16 %v478_v9, %v471_v62 }
  0x7a   : > { %2606 = vmatpush3.bf16.msra.mxu1 %v3401_v3  ;;  %2702 = vmatpush3.bf16.msra.mxu0 %v3401_v3  ;;  %v4359_v3 = vand.u32 4294901760, %v3366_v52  ;;  %v486_v23 = vsub.f32 %v3521_v28, %v485_v35 }
  0x7b   : > { %2608 = vmatprep.subr.bf16.mxu1 %v2607_v6  ;;  %2704 = vmatprep.subr.bf16.mxu0 %v3409_v7 }
  0x7c   : > { %v2711_v60 = vpack.c.bf16 %v436_v33, %v4359_v3  ;;  %v371_v3 = vsub.f32 %v3458_v54, %v370_v16  ;;  %v390_v33 = vand.u32 4294901760, %v3502_v50  ;;  %v2715_v54 = vpack.c.bf16 %v450_v59, %v443_v61 }
  0x7d   : > { %2344 = vmatmul.mubr.f32.vlgmr.msra.gmra.mrb[0].mxu1 %v332_v21  ;;  %2476 = vmatmul.mubr.f32.vlgmr.msra.gmra.mrb[0].mxu0 %v4361_v37  ;;  %v2615_v21 = vpack.c.bf16 %v438_v4, %v431_v47  ;;  %v381_v37 = vsub.f32 %v3477_v22, %v380_v30  ;;  %v4364_v61 = vand.u32 4294901760, %v3339_v41 }
  0x7e   : > { %2610 = vmatpush3.bf16.msra.mxu1 %v2607_v6  ;;  %2706 = vmatpush3.bf16.msra.mxu0 %v3409_v7  ;;  %v4363_v6 = vand.u32 4294901760, %v3335_v39  ;;  %v372_v47 = vand.u32 4294901760, %v371_v3  ;;  %v391_v4 = vsub.f32 %v3502_v50, %v390_v33 }
  0x7f   : > { %2612 = vmatprep.subr.bf16.mxu1 %v2611_v31  ;;  %2708 = vmatprep.subr.bf16.mxu0 %v3453_v56  ;;  %v382_v59 = vand.u32 4294901760, %v381_v37 }
  0x80   : > { %v3526_v7 = vsub.f32 %v3335_v39, %v4363_v6  ;;  %2346 = vmatprep.mubr.f32.mxu1 %v342_v36  ;;  %2478 = vmatprep.mubr.f32.mxu0 %v340_v20  ;;  %v472_v39 = vsub.f32 %v3491_v12, %v471_v62  ;;  %v479_v36 = vsub.f32 %v3496_v8, %v478_v9  ;;  %v392_v29 = vand.u32 4294901760, %v391_v4 }
  0x81   : > { %2347 = vmatmul.mubr.f32.gmra.mrb[2].mxu1 %v352_v53  ;;  %2479 = vmatmul.mubr.f32.gmra.mrb[2].mxu0 %v350_v63  ;;  %v3538_v63 = vsub.f32 %v3339_v41, %v4364_v61  ;;  %v4366_v53 = vand.u32 4294901760, %v3445_v15  ;;  %v2643_v4 = vpack.c.bf16 %v3354_v49, %v3346_v44  ;;  %v4368_v44 = vld [vmem:[#allocation11_spill] sm:$0xff]  ;;  %v4369_v49 = vld [vmem:[#allocation13_spill] sm:$0xff] }
  0x82   : > { %2614 = vmatpush3.bf16.msra.mxu1 %v2611_v31  ;;  %2710 = vmatpush3.bf16.msra.mxu0 %v3453_v56  ;;  %v492_v20 = vand.u32 4294901760, %v3526_v7  ;;  %v4365_v31 = vand.u32 4294901760, %v3341_v42  ;;  %v473_v27 = vand.u32 4294901760, %v472_v39  ;;  %v480_v41 = vand.u32 4294901760, %v479_v36 }
  0x83   : > { %2616 = vmatprep.subr.bf16.mxu1 %v2615_v21  ;;  %2712 = vmatprep.subr.bf16.mxu0 %v2711_v60  ;;  %v2719_v3 = vpack.c.bf16 %v464_v19, %v4366_v53 }
  0x84   : > { %v3543_v56 = vsub.f32 %v3341_v42, %v4365_v31  ;;  %2349 = vmatprep.mubr.f32.mxu1 %v362_v14  ;;  %2481 = vmatprep.mubr.f32.mxu0 %v360_v57  ;;  %v493_v42 = vsub.f32 %v3526_v7, %v492_v20  ;;  %v499_v57 = vand.u32 4294901760, %v3538_v63 }
  0x85   : > { %2350 = vmatmul.mubr.f32.gmra.mrb[4].mxu1 %v372_v47  ;;  %2482 = vmatmul.mubr.f32.gmra.mrb[4].mxu0 %v370_v16  ;;  %v487_v16 = vand.u32 4294901760, %v486_v23  ;;  %v2639_v47 = vpack.c.bf16 %v3337_v40, %v3321_v34  ;;  %v2647_v34 = vpack.c.bf16 %v3393_v1, %v3366_v52  ;;  %v4367_v40 = vld [vmem:[#allocation12_spill] sm:$0xff]  ;;  %v2663_v52 = vpack.c.bf16 %v3526_v7, %v3521_v28 }
  0x86   : > { %2618 = vmatpush3.bf16.msra.mxu1 %v2615_v21  ;;  %2714 = vmatpush3.bf16.msra.mxu0 %v2711_v60  ;;  %v506_v6 = vand.u32 4294901760, %v3543_v56  ;;  %v2627_v60 = vpack.c.bf16 %v480_v41, %v473_v27  ;;  %v494_v19 = vand.u32 4294901760, %v493_v42  ;;  %v500_v21 = vsub.f32 %v3538_v63, %v499_v57 }
  0x87   : > { %2620 = vmatprep.subr.bf16.mxu1 %v2619_v38  ;;  %2716 = vmatprep.subr.bf16.mxu0 %v2715_v54  ;;  %v2667_v1 = vpack.c.bf16 %v3543_v56, %v3538_v63 }
  0x88   : > { %2352 = vmatprep.mubr.f32.mxu1 %v382_v59  ;;  %2484 = vmatprep.mubr.f32.mxu0 %v380_v30  ;;  %v507_v14 = vsub.f32 %v3543_v56, %v506_v6  ;;  %v2631_v30 = vpack.c.bf16 %v494_v19, %v487_v16  ;;  %v2731_v37 = vpack.c.bf16 %v506_v6, %v499_v57 }
  0x89   : > { %2353 = vmatmul.mubr.f32.gmra.mrb[6].mxu1 %v392_v29  ;;  %2485 = vmatmul.mubr.f32.gmra.mrb[6].mxu0 %v390_v33  ;;  %v501_v33 = vand.u32 4294901760, %v500_v21 }
  0x8a   : > { %2622 = vmatpush3.bf16.msra.mxu1 %v2619_v38  ;;  %2718 = vmatpush3.bf16.msra.mxu0 %v2715_v54  ;;  %v2727_v54 = vpack.c.bf16 %v492_v20, %v485_v35  ;;  %v508_v62 = vand.u32 4294901760, %v507_v14 }
  0x8b   : > { %2624 = vmatprep.subr.bf16.mxu1 %v2623_v46  ;;  %2720 = vmatprep.subr.bf16.mxu0 %v2719_v3 }
  0x8c   : > { %2387 = vmatprep.mubr.f32.mxu1 %v3281_v17  ;;  %2519 = vmatprep.mubr.f32.mxu0 %v3281_v17  ;;  %v2635_v9 = vpack.c.bf16 %v508_v62, %v501_v33 }
  0x8e   : > { %2626 = vmatpush3.bf16.msra.mxu1 %v2623_v46  ;;  %2722 = vmatpush3.bf16.msra.mxu0 %v2719_v3 }
  0x8f   : > { %2628 = vmatprep.subr.bf16.mxu1 %v2627_v60  ;;  %2724 = vmatprep.subr.bf16.mxu0 %v2723_v48 }
  0x92   : > { %2630 = vmatpush3.bf16.msra.mxu1 %v2627_v60  ;;  %2726 = vmatpush3.bf16.msra.mxu0 %v2723_v48 }
  0x93   : > { %2632 = vmatprep.subr.bf16.mxu1 %v2631_v30  ;;  %2728 = vmatprep.subr.bf16.mxu0 %v2727_v54 }
  0x96   : > { %2634 = vmatpush3.bf16.msra.mxu1 %v2631_v30  ;;  %2730 = vmatpush3.bf16.msra.mxu0 %v2727_v54 }
  0x97   : > { %2636 = vmatprep.subr.bf16.mxu1 %v2635_v9  ;;  %2732 = vmatprep.subr.bf16.mxu0 %v2731_v37 }
  0x9a   : > { %2638 = vmatpush3.bf16.msra.mxu1 %v2635_v9  ;;  %2734 = vmatpush3.bf16.msra.mxu0 %v2731_v37 }
  0x9b   : > { %2640 = vmatprep.subr.bf16.mxu1 %v2639_v47  ;;  %2736 = vmatprep.subr.bf16.mxu0 %v3266_v10 }
  0x9d   : > { %2388 = vmatmul.mubr.f32.vlgmr.msra.gmra.mrb[0].mxu1 %v3317_v32  ;;  %2520 = vmatmul.mubr.f32.vlgmr.msra.gmra.mrb[0].mxu0 %v3317_v32 }
  0x9e   : > { %2642 = vmatpush3.bf16.msra.mxu1 %v2639_v47  ;;  %2738 = vmatpush3.bf16.msra.mxu0 %v3266_v10  ;;  %v2651_v10 = vpack.c.bf16 %v3427_v25, %v3418_v11  ;;  %v4372_v11 = vld [vmem:[#allocation16_spill] sm:$0xff]  ;;  %v4373_v25 = vld [vmem:[#allocation17_spill] sm:$0xff] }
  0x9f   : > { %2644 = vmatprep.subr.bf16.mxu1 %v2643_v4  ;;  %2740 = vmatprep.subr.bf16.mxu0 %v3270_v13 }
  0xa0   : > { %2390 = vmatprep.mubr.f32.mxu1 %v3370_v55  ;;  %2522 = vmatprep.mubr.f32.mxu0 %v3370_v55 }
  0xa1   : > { %2391 = vmatmul.mubr.f32.gmra.mrb[2].mxu1 %v3395_v2  ;;  %2523 = vmatmul.mubr.f32.gmra.mrb[2].mxu0 %v3395_v2 }
  0xa2   : > { %2646 = vmatpush3.bf16.msra.mxu1 %v2643_v4  ;;  %2742 = vmatpush3.bf16.msra.mxu0 %v3270_v13  ;;  %v2655_v13 = vpack.c.bf16 %v3466_v58, %v3445_v15  ;;  %v4374_v15 = vld [vmem:[#allocation18_spill] sm:$0xff]  ;;  %v4375_v58 = vld [vmem:[#allocation19_spill] sm:$0xff] }
  0xa3   : > { %2648 = vmatprep.subr.bf16.mxu1 %v2647_v34  ;;  %2744 = vmatprep.subr.bf16.mxu0 %v3287_v18 }
  0xa4   : > { %2393 = vmatprep.mubr.f32.mxu1 %v3406_v5  ;;  %2525 = vmatprep.mubr.f32.mxu0 %v3406_v5 }
  0xa5   : > { %2394 = vmatmul.mubr.f32.gmra.mrb[4].mxu1 %v3440_v45  ;;  %2526 = vmatmul.mubr.f32.gmra.mrb[4].mxu0 %v3440_v45 }
  0xa6   : > { %2650 = vmatpush3.bf16.msra.mxu1 %v2647_v34  ;;  %2746 = vmatpush3.bf16.msra.mxu0 %v3287_v18  ;;  %v2659_v18 = vpack.c.bf16 %v3496_v8, %v3491_v12 }
  0xa7   : > { %2652 = vmatprep.subr.bf16.mxu1 %v2651_v10  ;;  %2748 = vmatprep.subr.bf16.mxu0 %v3308_v26 }
  0xa8   : > { %2396 = vmatprep.mubr.f32.mxu1 %v3451_v51  ;;  %2528 = vmatprep.mubr.f32.mxu0 %v3451_v51 }
  0xa9   : > { %2397 = vmatmul.mubr.f32.gmra.mrb[6].mxu1 %v3482_v24  ;;  %2529 = vmatmul.mubr.f32.gmra.mrb[6].mxu0 %v3482_v24 }
  0xaa   : > { %2654 = vmatpush3.bf16.msra.mxu1 %v2651_v10  ;;  %2750 = vmatpush3.bf16.msra.mxu0 %v3308_v26  ;;  %v4370_v26 = vld [vmem:[#allocation14_spill] sm:$0xff]  ;;  %v3080_v10 = vmov 683565275  }
  0xab   : > { %2656 = vmatprep.subr.bf16.mxu1 %v2655_v13  ;;  %2752 = vmatprep.subr.bf16.mxu0 %v4367_v40 }
  0xac   : > { %2431 = vmatprep.mubr.f32.mxu1 %v4368_v44  ;;  %2563 = vmatprep.mubr.f32.mxu0 %v3281_v17  ;;  %v4371_v17 = vld [vmem:[#allocation15_spill] sm:$0xff]  ;;  %v3081_v44 = vmov 2475754826  }
  0xae   : > { %2658 = vmatpush3.bf16.msra.mxu1 %v2655_v13  ;;  %2754 = vmatpush3.bf16.msra.mxu0 %v4367_v40 }
  0xaf   : > { %2660 = vmatprep.subr.bf16.mxu1 %v2659_v18  ;;  %2756 = vmatprep.subr.bf16.mxu0 %v4369_v49 }
  0xb2   : > { %2662 = vmatpush3.bf16.msra.mxu1 %v2659_v18  ;;  %2758 = vmatpush3.bf16.msra.mxu0 %v4369_v49 }
  0xb3   : > { %2664 = vmatprep.subr.bf16.mxu1 %v2663_v52  ;;  %2760 = vmatprep.subr.bf16.mxu0 %v4370_v26 }
  0xb6   : > { %2666 = vmatpush3.bf16.msra.mxu1 %v2663_v52  ;;  %2762 = vmatpush3.bf16.msra.mxu0 %v4370_v26  ;;  %v3082_v52 = vmov 2131351028  }
  0xb7   : > { %2668 = vmatprep.subr.bf16.mxu1 %v2667_v1  ;;  %2764 = vmatprep.subr.bf16.mxu0 %v4371_v17 }
  0xba   : > { %2670 = vmatpush3.bf16.msra.mxu1 %v2667_v1  ;;  %2766 = vmatpush3.bf16.msra.mxu0 %v4371_v17  ;;  %v3083_v1 = vmov 2102212464  }
  0xbd   : > { %2432 = vmatmul.mubr.f32.vlgmr.msra.gmra.mrb[0].mxu1 %v3344_v43  ;;  %2564 = vmatmul.mubr.f32.vlgmr.msra.gmra.mrb[0].mxu0 %v3317_v32  ;;  %v3620_v32 = vld [vmem:[%s4315_s2] ss:$0 sm:$0xff] }
  0xbe   : > { %2434 = vmatprep.mubr.f32.mxu1 %v4372_v11  ;;  %2566 = vmatprep.mubr.f32.mxu0 %v3370_v55  ;;  %v3084_v11 = vmov 920167782  }
  0xc1   : > { %2435 = vmatmul.mubr.f32.gmra.mrb[2].mxu1 %v4373_v25  ;;  %2567 = vmatmul.mubr.f32.gmra.mrb[2].mxu0 %v3395_v2 }
  0xc2   : > { %2437 = vmatprep.mubr.f32.mxu1 %v4374_v15  ;;  %2569 = vmatprep.mubr.f32.mxu0 %v3406_v5 }
  0xc5   : > { %2438 = vmatmul.mubr.f32.gmra.mrb[4].mxu1 %v4375_v58  ;;  %2570 = vmatmul.mubr.f32.gmra.mrb[4].mxu0 %v3440_v45 }
  0xc6   : > { %2440 = vmatprep.mubr.f32.mxu1 %v3477_v22  ;;  %2572 = vmatprep.mubr.f32.mxu0 %v3451_v51 }
  0xc9   : > { %2441 = vmatmul.mubr.f32.gmra.mrb[6].mxu1 %v3502_v50  ;;  %2573 = vmatmul.mubr.f32.gmra.mrb[6].mxu0 %v3482_v24 }
 0x190   : > { %v2433_v43 = vpop.f32.mrb[0].mxu1  ;;  %v2565_v55 = vpop.f32.mrb[0].mxu0 }
 0x191   : > { %v2767_v2 = vadd.f32 %v2433_v43, %v3620_v32  ;;  %v691_v5 = vpop.f32.mrb[1].mxu1  ;;  %v1133_v8 = vpop.f32.mrb[1].mxu0 }
 0x192   : > { %v2769_v45 = vadd.f32 %v3620_v32, %v691_v5  ;;  %v3085_v5 = vmov 1326507024  }
 0x193   : > { %v3624_v22 = vadd.f32 %v2767_v2, %v2565_v55 }
 0x194   : > { %v3626_v51 = vadd.f32 %v2769_v45, %v1133_v8  ;;  %v2436_v50 = vpop.f32.mrb[2].mxu1  ;;  %v2568_v12 = vpop.f32.mrb[2].mxu0 }
 0x195   : > { %v1283_v24 = vand.u32 2147483647, %v3624_v22  ;;  %v1286_v28 = vand.u32 2139095040, %v3624_v22  ;;  %v705_v7 = vpop.f32.mrb[3].mxu1  ;;  %v1145_v38 = vpop.f32.mrb[3].mxu0  ;;  %v2771_v35 = vadd.f32 %v2436_v50, %v3620_v32  ;;  %vm1285_vm13 = vcmp.lt.s32.totalorder %v3624_v22, 0 }
 0x196   : > { %v1179_v0 = vand.u32 2147483647, %v3626_v51  ;;  %v1182_v39 = vand.u32 2139095040, %v3626_v51  ;;  %v2773_v31 = vadd.f32 %v3620_v32, %v705_v7  ;;  %vm1181_vm15 = vcmp.lt.s32.totalorder %v3626_v51, 0 }
 0x197   : > { %v1287_v36 = vshrl.u32 %v1286_v28, 23  ;;  %v1290_v20 = vand.u32 8388607, %v1283_v24  ;;  %v3640_v29 = vadd.f32 %v2771_v35, %v2568_v12  ;;  %vm3739_vm14 = vcmp.le.f32.partialorder %v1283_v24, 0.7853982 }
 0x198   : > { %v1183_v61 = vshrl.u32 %v1182_v39, 23  ;;  %v1186_v63 = vand.u32 8388607, %v1179_v0  ;;  %v3638_v56 = vpop.f32.mrb[4].mxu1  ;;  %v3642_v46 = vpop.f32.mrb[4].mxu0  ;;  %v3646_v27 = vadd.f32 %v2773_v31, %v1145_v38 }
 0x199   : > { %v2132_v59 = vadd.s32 4294967169, %v1287_v36  ;;  %v3644_v53 = vpop.f32.mrb[5].mxu1  ;;  %v3648_v41 = vpop.f32.mrb[5].mxu0  ;;  %v1291_v42 = vor.u32 8388608, %v1290_v20  ;;  %v1494_v60 = vand.u32 2139095040, %v3640_v29 }
 0x19a   : > { %v2128_v3 = vadd.s32 4294967169, %v1183_v61  ;;  %v1187_v57 = vor.u32 8388608, %v1186_v63  ;;  %v1491_v4 = vand.u32 2147483647, %v3640_v29 }
 0x19b   : > { %v1293_v23 = vadd.s32 1, %v2132_v59  ;;  %v1495_v21 = vshrl.u32 %v1494_v60, 23  ;;  %v3659_v9 = vshll.u32 %v1291_v42, 8 }
 0x19c   : > { %v1189_v6 = vadd.s32 1, %v2128_v3  ;;  %v3651_v48 = vpop.f32.mrb[6].mxu1  ;;  %v3653_v16 = vpop.f32.mrb[6].mxu0  ;;  %v3663_v47 = vshll.u32 %v1187_v57, 8 }
 0x19d   : > { %vm1294_vm0 = vcmp.gt.s32.totalorder %v1293_v23, 0  ;;  %v3655_v14 = vpop.f32.mrb[7].mxu1  ;;  %v3657_v62 = vpop.f32.mrb[7].mxu0  ;;  %v3667_v18 = vadd.s32 4294967169, %v1495_v21 }
 0x19e   : > { %v1295_v19 = vsel %vm1294_vm0, %v1293_v23, 0  ;;  %vm1190_vm1 = vcmp.gt.s32.totalorder %v1189_v6, 0 }
 0x19f   : > { %v1296_v30 = vshrl.u32 %v1295_v19, 5  ;;  %v1297_v54 = vand.u32 31, %v1295_v19  ;;  %v1191_v33 = vsel %vm1190_vm1, %v1189_v6, 0 }
 0x1a0   : > { %v3661_v37 = vshrl.u32 %v1191_v33, 5  ;;  %v1193_v40 = vand.u32 31, %v1191_v33 }
 0x1a1   : > { %v1298_v34 = vsub.s32 32, %v1297_v54  ;;  %v1300_v13 = vshll.u32 %v3080_v10, %v1297_v54  ;;  %v1303_v49 = vshll.u32 %v3081_v44, %v1297_v54  ;;  %v1306_v26 = vshll.u32 %v3082_v52, %v1297_v54 }
 0x1a2   : > { %v1309_v17 = vshll.u32 %v3083_v1, %v1297_v54  ;;  %v1312_v25 = vshll.u32 %v3084_v11, %v1297_v54  ;;  %vm1315_vm2 = vcmp.lt.s32.totalorder %v1296_v30, 1  ;;  %vm1316_vm3 = vcmp.lt.s32.totalorder %v1296_v30, 2 }
 0x1a3   : > { %v1301_v15 = vshrl.u32 %v3081_v44, %v1298_v34  ;;  %v1304_v58 = vshrl.u32 %v3082_v52, %v1298_v34  ;;  %v1307_v43 = vshrl.u32 %v3083_v1, %v1298_v34  ;;  %v1299_v55 = vshrl.u32 %v3080_v10, %v1298_v34 }
 0x1a4   : > { %v1310_v2 = vshrl.u32 %v3084_v11, %v1298_v34  ;;  %v1313_v8 = vshrl.u32 %v3085_v5, %v1298_v34  ;;  %v1194_v28 = vsub.s32 32, %v1193_v40  ;;  %vm1317_vm4 = vcmp.lt.s32.totalorder %v1296_v30, 3 }
 0x1a5   : > { %v1302_v45 = vor.u32 %v1301_v15, %v1300_v13  ;;  %v1305_v50 = vor.u32 %v1304_v58, %v1303_v49  ;;  %v1308_v12 = vor.u32 %v1307_v43, %v1306_v26  ;;  %vm1318_vm5 = vcmp.lt.s32.totalorder %v1296_v30, 4 }
 0x1a6   : > { %v1311_v7 = vor.u32 %v1310_v2, %v1309_v17  ;;  %v1314_v38 = vor.u32 %v1313_v8, %v1312_v25  ;;  %v1196_v59 = vshll.u32 %v3080_v10, %v1193_v40  ;;  %v1197_v42 = vshrl.u32 %v3081_v44, %v1194_v28 }
 0x1a7   : > { %v1319_v39 = vsel %vm1315_vm2, %v1299_v55, %v1302_v45  ;;  %v1320_v36 = vsel %vm1318_vm5, %v1308_v12, 2102212464  ;;  %v1323_v35 = vsel %vm1315_vm2, %v1302_v45, %v1305_v50  ;;  %v1327_v20 = vsel %vm1315_vm2, %v1305_v50, %v1308_v12 }
 0x1a8   : > { %v1321_v61 = vsel %vm1317_vm4, %v1305_v50, %v1320_v36  ;;  %v1324_v63 = vsel %vm1318_vm5, %v1311_v7, 920167782  ;;  %v1328_v31 = vsel %vm1318_vm5, %v1314_v38, 1326507024  ;;  %v1199_v57 = vshll.u32 %v3081_v44, %v1193_v40 }
 0x1a9   : > { %v1325_v3 = vsel %vm1317_vm4, %v1308_v12, %v1324_v63  ;;  %v1329_v23 = vsel %vm1317_vm4, %v1311_v7, %v1328_v31  ;;  %v1322_v6 = vsel %vm1316_vm3, %v1319_v39, %v1321_v61  ;;  %v1200_v21 = vshrl.u32 %v3082_v52, %v1194_v28 }
 0x1aa   : > { %v1326_v60 = vsel %vm1316_vm3, %v1323_v35, %v1325_v3  ;;  %v1330_v19 = vsel %vm1316_vm3, %v1327_v20, %v1329_v23  ;;  %v1198_v49 = vor.u32 %v1197_v42, %v1196_v59  ;;  %v1202_v17 = vshll.u32 %v3082_v52, %v1193_v40 }
 0x1ab   : > { %v3690_v54 = vmul.u32.u64.low %v3659_v9, %v1330_v19  ;;  %v3691_v33 = vmul.u32.u64.high %v3659_v9, %v1330_v19, %v3690_v54  ;;  %v3694_v34 = vmul.u32.u64.low %v3659_v9, %v1326_v60  ;;  %v3695_v13 = vmul.u32.u64.high %v3659_v9, %v1326_v60, %v3694_v34 }
 0x1ac   : > { %v1201_v26 = vor.u32 %v1200_v21, %v1199_v57  ;;  %v1203_v25 = vshrl.u32 %v3083_v1, %v1194_v28  ;;  %v1195_v15 = vshrl.u32 %v3080_v10, %v1194_v28  ;;  %v1205_v30 = vshll.u32 %v3083_v1, %v1193_v40 }
 0x1ad   : > { %v1206_v58 = vshrl.u32 %v3084_v11, %v1194_v28  ;;  %v1209_v43 = vshrl.u32 %v3085_v5, %v1194_v28  ;;  %v1338_v55 = vmul.u32 %v3659_v9, %v1322_v6  ;;  %v1208_v8 = vshll.u32 %v3084_v11, %v1193_v40 }
 0x1ae   : > { %v1204_v2 = vor.u32 %v1203_v25, %v1202_v17  ;;  %vm1211_vm6 = vcmp.lt.s32.totalorder %v3661_v37, 1  ;;  %vm1340_vm7 = vc.u32 %v3691_v33, %v3694_v34  ;;  %v1341_v45 = vadd.s32 1, %v3695_v13 }
 0x1af   : > { %v1207_v50 = vor.u32 %v1206_v58, %v1205_v30  ;;  %vm1212_vm8 = vcmp.lt.s32.totalorder %v3661_v37, 2  ;;  %v1210_v12 = vor.u32 %v1209_v43, %v1208_v8  ;;  %vm1213_vm9 = vcmp.lt.s32.totalorder %v3661_v37, 3 }
 0x1b0   : > { %vm1214_vm10 = vcmp.lt.s32.totalorder %v3661_v37, 4  ;;  %v1219_v28 = vsel %vm1211_vm6, %v1198_v49, %v1201_v26  ;;  %v1342_v9 = vsel %vm1340_vm7, %v1341_v45, %v3695_v13  ;;  %v1223_v40 = vsel %vm1211_vm6, %v1201_v26, %v1204_v2 }
 0x1b1   : > { %v1216_v7 = vsel %vm1214_vm10, %v1204_v2, 2102212464  ;;  %v1220_v38 = vsel %vm1214_vm10, %v1207_v50, 920167782  ;;  %v1343_v39 = vadd.s32 %v1342_v9, %v1338_v55  ;;  %v1215_v36 = vsel %vm1211_vm6, %v1195_v15, %v1198_v49 }
 0x1b2   : > { %v1221_v35 = vsel %vm1213_vm9, %v1204_v2, %v1220_v38  ;;  %v1224_v20 = vsel %vm1214_vm10, %v1210_v12, 1326507024  ;;  %v1217_v61 = vsel %vm1213_vm9, %v1201_v26, %v1216_v7  ;;  %v1501_v59 = vadd.s32 1, %v3667_v18 }
 0x1b3   : > { %v1222_v63 = vsel %vm1212_vm8, %v1219_v28, %v1221_v35  ;;  %v1225_v31 = vsel %vm1213_vm9, %v1207_v50, %v1224_v20  ;;  %v1344_v3 = vadd.s32 536870912, %v1343_v39  ;;  %v1498_v19 = vand.u32 8388607, %v1491_v4 }
 0x1b4   : > { %v1226_v23 = vsel %vm1212_vm8, %v1223_v40, %v1225_v31  ;;  %v3718_v42 = vmul.u32.u64.low %v3663_v47, %v1222_v63  ;;  %v3719_v57 = vmul.u32.u64.high %v3663_v47, %v1222_v63, %v3718_v42  ;;  %vm1502_vm11 = vcmp.gt.s32.totalorder %v1501_v59, 0 }
 0x1b5   : > { %v3722_v6 = vmul.u32.u64.low %v3663_v47, %v1226_v23  ;;  %v3723_v60 = vmul.u32.u64.high %v3663_v47, %v1226_v23, %v3722_v6  ;;  %v1345_v21 = vshrl.u32 %v1344_v3, 30  ;;  %v1218_v18 = vsel %vm1212_vm8, %v1215_v36, %v1217_v61 }
 0x1b6   : > { %v1503_v54 = vsel %vm1502_vm11, %v1501_v59, 0  ;;  %v1237_v26 = vadd.s32 1, %v3719_v57  ;;  %v1234_v17 = vmul.u32 %v3663_v47, %v1218_v18  ;;  %v1499_v25 = vor.u32 8388608, %v1498_v19 }
 0x1b7   : > { %v1505_v13 = vand.u32 31, %v1503_v54  ;;  %v1346_v49 = vshll.u32 %v1345_v21, 30  ;;  %vm1236_vm12 = vc.u32 %v3723_v60, %v3718_v42  ;;  %v1390_v37 = vand.u32 2139095040, %v3646_v27 }
 0x1b8   : > { %v1238_v58 = vsel %vm1236_vm12, %v1237_v26, %v3719_v57  ;;  %v1369_v55 = vsub.s32 4, %v1345_v21  ;;  %v3745_v2 = vadd.f32 %v3638_v56, %v3620_v32  ;;  %v1339_v8 = vadd.s32 %v3694_v34, %v3691_v33 }
 0x1b9   : > { %v1506_v15 = vsub.s32 32, %v1505_v13  ;;  %v3733_v30 = vsub.s32 %v1343_v39, %v1346_v49  ;;  %v1239_v47 = vadd.s32 %v1238_v58, %v1234_v17  ;;  %v1387_v50 = vand.u32 2147483647, %v3646_v27 }
 0x1ba   : > { %v3752_v12 = vadd.f32 %v3620_v32, %v3644_v53  ;;  %v3754_v28 = vshrl.u32 %v1503_v54, 5  ;;  %v3757_v7 = vshll.u32 %v1499_v25, 8  ;;  %v1391_v34 = vshrl.u32 %v1390_v37, 23 }
 0x1bb   : > { %v1349_v45 = vsub.s32 0, %v3733_v30  ;;  %v1240_v24 = vadd.s32 536870912, %v1239_v47  ;;  %v1509_v9 = vshrl.u32 %v3081_v44, %v1506_v15  ;;  %v1512_v38 = vshrl.u32 %v3082_v52, %v1506_v15 }
 0x1bc   : > { %v1515_v33 = vshrl.u32 %v3083_v1, %v1506_v15  ;;  %v3764_v40 = vsel %vm1285_vm13, %v1369_v55, %v1345_v21  ;;  %v1508_v39 = vshll.u32 %v3080_v10, %v1505_v13  ;;  %v1518_v36 = vshrl.u32 %v3084_v11, %v1506_v15 }
 0x1bd   : > { %v2133_v56 = vmin.u32 %v1349_v45, %v3733_v30  ;;  %v1241_v53 = vshrl.u32 %v1240_v24, 30  ;;  %v1511_v20 = vshll.u32 %v3081_v44, %v1505_v13  ;;  %v1514_v61 = vshll.u32 %v3082_v52, %v1505_v13 }
 0x1be   : > { %v1521_v63 = vshrl.u32 %v3085_v5, %v1506_v15  ;;  %v3772_v31 = vadd.s32 %v3718_v42, %v3723_v60  ;;  %v1510_v3 = vor.u32 %v1509_v9, %v1508_v39  ;;  %v1517_v23 = vshll.u32 %v3083_v1, %v1505_v13 }
 0x1bf   : > { %v1351_v35 = vclz %v2133_v56  ;;  %v1242_v59 = vshll.u32 %v1241_v53, 30  ;;  %v1513_v6 = vor.u32 %v1512_v38, %v1511_v20  ;;  %v1516_v19 = vor.u32 %v1515_v33, %v1514_v61 }
 0x1c0   : > { %v1520_v21 = vshll.u32 %v3084_v11, %v1505_v13  ;;  %v1372_v18 = vsel %vm3739_vm14, 0, %v3764_v40  ;;  %v1507_v42 = vshrl.u32 %v3080_v10, %v1506_v15  ;;  %v1519_v60 = vor.u32 %v1518_v36, %v1517_v23 }
 0x1c1   : > { %v2134_v57 = vadd.s32 4294967294, %v1351_v35  ;;  %v3780_v54 = vsub.s32 %v1239_v47, %v1242_v59  ;;  %v1265_v49 = vsub.s32 4, %v1241_v53  ;;  %vm1523_vm1 = vcmp.lt.s32.totalorder %v3754_v28, 1 }
 0x1c2   : > { %v1522_v26 = vor.u32 %v1521_v63, %v1520_v21  ;;  %vm1525_vm2 = vcmp.lt.s32.totalorder %v3754_v28, 3  ;;  %vm1526_vm3 = vcmp.lt.s32.totalorder %v3754_v28, 4  ;;  %vm3789_vm4 = vcmp.le.f32.partialorder %v1179_v0, 0.7853982 }
 0x1c3   : > { %vm2135_vm0 = vcmp.lt.s32.totalorder %v2134_v57, 0  ;;  %v1245_v25 = vsub.s32 0, %v3780_v54  ;;  %v1528_v15 = vsel %vm1526_vm3, %v1516_v19, 2102212464  ;;  %v1531_v55 = vsel %vm1523_vm1, %v1510_v3, %v1513_v6 }
 0x1c4   : > { %v1354_v17 = vsel %vm2135_vm0, 0, %v2134_v57  ;;  %v1532_v24 = vsel %vm1526_vm3, %v1519_v60, 920167782  ;;  %v1535_v9 = vsel %vm1523_vm1, %v1513_v6, %v1516_v19  ;;  %v1536_v33 = vsel %vm1526_vm3, %v1522_v26, 1326507024 }
 0x1c5   : > { %v1355_v13 = vsub.s32 32, %v1354_v17  ;;  %v1359_v58 = vsub.s32 4294967266, %v1354_v17  ;;  %v1356_v47 = vshll.u32 %v3733_v30, %v1354_v17  ;;  %v2129_v45 = vmin.u32 %v1245_v25, %v3780_v54 }
 0x1c6   : > { %v1533_v0 = vsel %vm1525_vm2, %v1516_v19, %v1532_v24  ;;  %vm1524_vm5 = vcmp.lt.s32.totalorder %v3754_v28, 2  ;;  %v1527_v36 = vsel %vm1523_vm1, %v1507_v42, %v1510_v3  ;;  %v1529_v30 = vsel %vm1525_vm2, %v1513_v6, %v1528_v15 }
 0x1c7   : > { %v1357_v56 = vshrl.u32 %v1339_v8, %v1355_v13  ;;  %v1360_v38 = vadd.s32 127, %v1359_v58  ;;  %v1247_v39 = vclz %v2129_v45  ;;  %v1534_v61 = vsel %vm1524_vm5, %v1531_v55, %v1533_v0 }
 0x1c8   : > { %v1537_v8 = vsel %vm1525_vm2, %v1519_v60, %v1536_v33  ;;  %v3809_v23 = vmul.u32.u64.low %v3757_v7, %v1534_v61  ;;  %v3810_v57 = vmul.u32.u64.high %v3757_v7, %v1534_v61, %v3809_v23  ;;  %v1266_v21 = vsel %vm1181_vm15, %v1265_v49, %v1241_v53 }
 0x1c9   : > { %v1358_v35 = vor.u32 %v1357_v56, %v1356_v47  ;;  %v1361_v20 = vshll.u32 %v1360_v38, 23  ;;  %v2130_v63 = vadd.s32 4294967294, %v1247_v39  ;;  %v1538_v59 = vsel %vm1524_vm5, %v1535_v9, %v1537_v8 }
 0x1ca   : > { %v3815_v3 = vmul.u32.u64.low %v3757_v7, %v1538_v59  ;;  %v3816_v42 = vmul.u32.u64.high %v3757_v7, %v1538_v59, %v3815_v3  ;;  %v1530_v26 = vsel %vm1524_vm5, %v1527_v36, %v1529_v30  ;;  %v2136_v17 = vadd.s32 4294967169, %v1391_v34 }
 0x1cb   : > { %v1362_v19 = vor.u32 4788187, %v1361_v20  ;;  %v1365_v6 = vcvt.s32.f32 %v1358_v35  ;;  %vm2131_vm6 = vcmp.lt.s32.totalorder %v2130_v63, 0  ;;  %v3820_v25 = vadd.f32 %v3745_v2, %v3642_v46 }
 0x1cc   : > { %v1250_v60 = vsel %vm2131_vm6, 0, %v2130_v63  ;;  %v3824_v13 = vadd.f32 %v3752_v12, %v3648_v41  ;;  %v1268_v49 = vsel %vm3789_vm4, 0, %v1266_v21  ;;  %v1549_v15 = vadd.s32 1, %v3810_v57 }
 0x1cd   : > { %v1363_v28 = vand.u32 2147483647, %v1362_v19  ;;  %v1251_v58 = vsub.s32 32, %v1250_v60  ;;  %v1255_v53 = vsub.s32 4294967266, %v1250_v60  ;;  %v1546_v34 = vmul.u32 %v3757_v7, %v1530_v26 }
 0x1ce   : > { %vm1548_vm7 = vc.u32 %v3816_v42, %v3809_v23  ;;  %v1397_v47 = vadd.s32 1, %v2136_v17  ;;  %v1252_v46 = vshll.u32 %v3780_v54, %v1250_v60  ;;  %v1376_v24 = vadd.s32 3, %v1372_v18 }
 0x1cf   : > { %v1366_v55 = vmul.f32 %v1365_v6, %v1363_v28  ;;  %v1253_v2 = vshrl.u32 %v3772_v31, %v1251_v58  ;;  %v1256_v45 = vadd.s32 127, %v1255_v53  ;;  %v1550_v41 = vsel %vm1548_vm7, %v1549_v15, %v3810_v57 }
 0x1d0   : > { %v1551_v9 = vadd.s32 %v1550_v41, %v1546_v34  ;;  %vm1398_vm8 = vcmp.gt.s32.totalorder %v1397_v47, 0  ;;  %v1394_v38 = vand.u32 8388607, %v1387_v50  ;;  %v1272_v54 = vadd.s32 3, %v1268_v49 }
 0x1d1   : > { %v1367_v12 = vxor.u32 2147483648, %v1366_v55  ;;  %v1254_v56 = vor.u32 %v1253_v2, %v1252_v46  ;;  %v1257_v7 = vshll.u32 %v1256_v45, 23  ;;  %v1399_v0 = vsel %vm1398_vm8, %v1397_v47, 0 }
 0x1d2   : > { %v1552_v33 = vadd.s32 536870912, %v1551_v9  ;;  %v1401_v39 = vand.u32 31, %v1399_v0  ;;  %v3845_v18 = vand.u32 3, %v1376_v24  ;;  %vm1493_vm9 = vcmp.lt.s32.totalorder %v3640_v29, 0 }
 0x1d3   : > { %v1368_v31 = vsel %vm1285_vm13, %v1367_v12, %v1366_v55  ;;  %v1258_v40 = vor.u32 4788187, %v1257_v7  ;;  %v1261_v61 = vcvt.s32.f32 %v1254_v56  ;;  %v3848_v8 = vand.u32 3, %v1272_v54 }
 0x1d4   : > { %v1371_v36 = vsel %vm3739_vm14, %v3624_v22, %v1368_v31  ;;  %v1553_v30 = vshrl.u32 %v1552_v33, 30  ;;  %v1402_v35 = vsub.s32 32, %v1401_v39  ;;  %v1395_v59 = vor.u32 8388608, %v1394_v38 }
 0x1d5   : > { %2914 = vcosq.f32 %v1371_v36  ;;  %v1259_v20 = vand.u32 2147483647, %v1258_v40  ;;  %v3852_v43 = vadd.s32 %v3809_v23, %v3816_v42  ;;  %vm1382_vm10 = vcmp.eq.s32.totalorder %v3845_v18, 2 }
 0x1d6   : > { %2916 = vsinq.f32 %v1371_v36  ;;  %v1554_v63 = vshll.u32 %v1553_v30, 30  ;;  %v1405_v57 = vshrl.u32 %v3081_v44, %v1402_v35  ;;  %v1408_v21 = vshrl.u32 %v3082_v52, %v1402_v35 }
 0x1d7   : > { %v1262_v19 = vmul.f32 %v1261_v61, %v1259_v20  ;;  %v1411_v3 = vshrl.u32 %v3083_v1, %v1402_v35  ;;  %v3859_v26 = vshrl.u32 %v1399_v0, 5  ;;  %v1404_v17 = vshll.u32 %v3080_v10, %v1401_v39 }
 0x1d8   : > { %v3857_v6 = vsub.s32 %v1551_v9, %v1554_v63  ;;  %v1414_v28 = vshrl.u32 %v3084_v11, %v1402_v35  ;;  %vm1379_vm11 = vcmp.eq.s32.totalorder %v3845_v18, 0  ;;  %v1577_v58 = vsub.s32 4, %v1553_v30 }
 0x1d9   : > { %v1263_v60 = vxor.u32 2147483648, %v1262_v19  ;;  %v1407_v23 = vshll.u32 %v3081_v44, %v1401_v39  ;;  %v1410_v42 = vshll.u32 %v3082_v52, %v1401_v39  ;;  %vm1378_vm12 = vcmp.lt.s32.totalorder %v3845_v18, 2 }
 0x1da   : > { %v1557_v53 = vsub.s32 0, %v3857_v6  ;;  %v1406_v49 = vor.u32 %v1405_v57, %v1404_v17  ;;  %v1413_v15 = vshll.u32 %v3083_v1, %v1401_v39  ;;  %v3869_v55 = vshll.u32 %v1395_v59, 8 }
 0x1db   : > { %vm1375_vm13 = vweird.f32 %v3624_v22  ;;  %v1264_v34 = vsel %vm1181_vm15, %v1263_v60, %v1262_v19  ;;  %v1409_v47 = vor.u32 %v1408_v21, %v1407_v23  ;;  %v1412_v46 = vor.u32 %v1411_v3, %v1410_v42 }
 0x1dc   : > { %v1417_v2 = vshrl.u32 %v3085_v5, %v1402_v35  ;;  %v1267_v45 = vsel %vm3789_vm4, %v3626_v51, %v1264_v34  ;;  %v2141_v41 = vmin.u32 %v1557_v53, %v3857_v6  ;;  %v1415_v12 = vor.u32 %v1414_v28, %v1413_v15 }
 0x1dd   : > { %v1416_v24 = vshll.u32 %v3084_v11, %v1401_v39  ;;  %2918 = vcosq.f32 %v1267_v45  ;;  %v1578_v9 = vsel %vm1493_vm9, %v1577_v58, %v1553_v30  ;;  %v1403_v56 = vshrl.u32 %v3080_v10, %v1402_v35 }
 0x1de   : > { %vm1419_vm14 = vcmp.lt.s32.totalorder %v3859_v26, 1  ;;  %2920 = vsinq.f32 %v1267_v45  ;;  %vm3886_vm15 = vcmp.le.f32.partialorder %v1491_v4, 0.7853982  ;;  %v1559_v38 = vclz %v2141_v41 }
 0x1df   : > { %v2915_v7 = vpop.eup %2914  ;;  %v1418_v0 = vor.u32 %v1417_v2, %v1416_v24  ;;  %vm1420_vm0 = vcmp.lt.s32.totalorder %v3859_v26, 2  ;;  %vm1421_vm1 = vcmp.lt.s32.totalorder %v3859_v26, 3  ;;  %vm1422_vm2 = vcmp.lt.s32.totalorder %v3859_v26, 4 }
 0x1e0   : > { %v2917_v31 = vpop.eup %2916  ;;  %v1383_v54 = vxor.u32 2147483648, %v2915_v7  ;;  %v1427_v33 = vsel %vm1419_vm14, %v1406_v49, %v1409_v47  ;;  %v2142_v36 = vadd.s32 4294967294, %v1559_v38  ;;  %v1424_v40 = vsel %vm1422_vm2, %v1412_v46, 2102212464 }
 0x1e1   : > { %v1380_v39 = vxor.u32 2147483648, %v2917_v31  ;;  %v1428_v4 = vsel %vm1422_vm2, %v1415_v12, 920167782  ;;  %v1423_v35 = vsel %vm1419_vm14, %v1403_v56, %v1406_v49  ;;  %v1431_v61 = vsel %vm1419_vm14, %v1409_v47, %v1412_v46 }
 0x1e2   : > { %v1384_v30 = vsel %vm1382_vm10, %v1383_v54, %v2917_v31  ;;  %v1429_v20 = vsel %vm1421_vm1, %v1412_v46, %v1428_v4  ;;  %vm2143_vm3 = vcmp.lt.s32.totalorder %v2142_v36, 0  ;;  %v1432_v57 = vsel %vm1422_vm2, %v1418_v0, 1326507024 }
 0x1e3   : > { %v1381_v63 = vsel %vm1379_vm11, %v2915_v7, %v1380_v39  ;;  %v1430_v59 = vsel %vm1420_vm0, %v1427_v33, %v1429_v20  ;;  %v1562_v21 = vsel %vm2143_vm3, 0, %v2142_v36  ;;  %v1425_v3 = vsel %vm1421_vm1, %v1409_v47, %v1424_v40 }
 0x1e4   : > { %v1385_v19 = vsel %vm1378_vm12, %v1381_v63, %v1384_v30  ;;  %v1433_v17 = vsel %vm1421_vm1, %v1415_v12, %v1432_v57  ;;  %vm1271_vm4 = vweird.f32 %v3626_v51  ;;  %v1563_v60 = vsub.s32 32, %v1562_v21 }
 0x1e5   : > { %v1386_v28 = vsel %vm1375_vm13, nan, %v1385_v19  ;;  %v1564_v58 = vshll.u32 %v3857_v6, %v1562_v21  ;;  %v1567_v23 = vsub.s32 4294967266, %v1562_v21  ;;  %v1434_v18 = vsel %vm1420_vm0, %v1431_v61, %v1433_v17 }
 0x1e6   : > { %2012 = vst [vmem:[%s3919_s8 + $0x8] sm:$0xff] %v1386_v28  ;;  %v3925_v42 = vmul.u32.u64.low %v3869_v55, %v1430_v59  ;;  %v3926_v53 = vmul.u32.u64.high %v3869_v55, %v1430_v59, %v3925_v42  ;;  %v1702_v22 = vand.u32 2139095040, %v3820_v25  ;;  %v1565_v49 = vshrl.u32 %v3852_v43, %v1563_v60 }
 0x1e7   : > { %v1568_v15 = vadd.s32 127, %v1567_v23  ;;  %v3932_v6 = vmul.u32.u64.low %v3869_v55, %v1434_v18  ;;  %v3933_v34 = vmul.u32.u64.high %v3869_v55, %v1434_v18, %v3932_v6  ;;  %v2919_v47 = vpop.eup %2918  ;;  %vm1274_vm5 = vcmp.lt.s32.totalorder %v3848_v8, 2 }
 0x1e8   : > { %vm1278_vm6 = vcmp.eq.s32.totalorder %v3848_v8, 2  ;;  %v1580_v46 = vsel %vm3886_vm15, 0, %v1578_v9  ;;  %v1703_v2 = vshrl.u32 %v1702_v22, 23  ;;  %v2921_v45 = vpop.eup %2920  ;;  %v1279_v41 = vxor.u32 2147483648, %v2919_v47 }
 0x1e9   : > { %v1566_v12 = vor.u32 %v1565_v49, %v1564_v58  ;;  %v1569_v24 = vshll.u32 %v1568_v15, 23  ;;  %v1426_v43 = vsel %vm1420_vm0, %v1423_v35, %v1425_v3  ;;  %v1276_v56 = vxor.u32 2147483648, %v2921_v45 }
 0x1ea   : > { %v1445_v7 = vadd.s32 1, %v3926_v53  ;;  %v1699_v38 = vand.u32 2147483647, %v3820_v25  ;;  %v2148_v0 = vadd.s32 4294967169, %v1703_v2  ;;  %vm1275_vm7 = vcmp.eq.s32.totalorder %v3848_v8, 0 }
 0x1eb   : > { %v1280_v31 = vsel %vm1278_vm6, %v1279_v41, %v2921_v45  ;;  %v1570_v54 = vor.u32 4788187, %v1569_v24  ;;  %v1584_v9 = vadd.s32 3, %v1580_v46  ;;  %v1277_v33 = vsel %vm1275_vm7, %v2919_v47, %v1276_v56 }
 0x1ec   : > { %v1442_v39 = vmul.u32 %v3869_v55, %v1426_v43  ;;  %vm1444_vm8 = vc.u32 %v3933_v34, %v3925_v42  ;;  %v1709_v26 = vadd.s32 1, %v2148_v0  ;;  %v1281_v36 = vsel %vm1274_vm5, %v1277_v33, %v1280_v31 }
 0x1ed   : > { %v1571_v40 = vand.u32 2147483647, %v1570_v54  ;;  %v1573_v4 = vcvt.s32.f32 %v1566_v12  ;;  %v1446_v30 = vsel %vm1444_vm8, %v1445_v7, %v3926_v53  ;;  %v1282_v35 = vsel %vm1271_vm4, nan, %v1281_v36 }
 0x1ee   : > { %v1447_v20 = vadd.s32 %v1446_v30, %v1442_v39  ;;  %v1706_v61 = vand.u32 8388607, %v1699_v38  ;;  %vm1710_vm10 = vcmp.gt.s32.totalorder %v1709_v26, 0  ;;  %2011 = vst [vmem:[%s3919_s8] sm:$0xff] %v1282_v35  ;;  %v3955_v8 = vand.u32 3, %v1584_v9 }
 0x1ef   : > { %v1574_v55 = vmul.f32 %v1573_v4, %v1571_v40  ;;  %v1711_v63 = vsel %vm1710_vm10, %v1709_v26, 0  ;;  %vm1389_vm11 = vcmp.lt.s32.totalorder %v3646_v27, 0  ;;  %v1595_v51 = vand.u32 2147483647, %v3824_v13 }
 0x1f0   : > { %v1448_v59 = vadd.s32 536870912, %v1447_v20  ;;  %v1713_v57 = vand.u32 31, %v1711_v63  ;;  %v1707_v3 = vor.u32 8388608, %v1706_v61  ;;  %v3961_v60 = vshrl.u32 %v1711_v63, 5 }
 0x1f1   : > { %v1575_v19 = vxor.u32 2147483648, %v1574_v55  ;;  %v1598_v23 = vand.u32 2139095040, %v3824_v13  ;;  %vm1590_vm12 = vcmp.eq.s32.totalorder %v3955_v8, 2  ;;  %v1443_v54 = vadd.s32 %v3925_v42, %v3933_v34 }
 0x1f2   : > { %v1449_v21 = vshrl.u32 %v1448_v59, 30  ;;  %v1714_v17 = vsub.s32 32, %v1713_v57  ;;  %v1716_v58 = vshll.u32 %v3080_v10, %v1713_v57  ;;  %v1719_v22 = vshll.u32 %v3081_v44, %v1713_v57 }
 0x1f3   : > { %v1576_v28 = vsel %vm1493_vm9, %v1575_v19, %v1574_v55  ;;  %v1722_v49 = vshll.u32 %v3082_v52, %v1713_v57  ;;  %v1725_v2 = vshll.u32 %v3083_v1, %v1713_v57  ;;  %v1728_v24 = vshll.u32 %v3084_v11, %v1713_v57 }
 0x1f4   : > { %v1579_v18 = vsel %vm3886_vm15, %v3640_v29, %v1576_v28  ;;  %v1450_v53 = vshll.u32 %v1449_v21, 30  ;;  %v1717_v15 = vshrl.u32 %v3081_v44, %v1714_v17  ;;  %v1720_v6 = vshrl.u32 %v3082_v52, %v1714_v17 }
 0x1f5   : > { %2922 = vcosq.f32 %v1579_v18  ;;  %v1723_v47 = vshrl.u32 %v3083_v1, %v1714_v17  ;;  %v1726_v37 = vshrl.u32 %v3084_v11, %v1714_v17  ;;  %v1473_v45 = vsub.s32 4, %v1449_v21 }
 0x1f6   : > { %2924 = vsinq.f32 %v1579_v18  ;;  %v3973_v46 = vsub.s32 %v1447_v20, %v1450_v53  ;;  %v1718_v41 = vor.u32 %v1717_v15, %v1716_v58  ;;  %v1721_v12 = vor.u32 %v1720_v6, %v1719_v22 }
 0x1f7   : > { %vm3980_vm9 = vcmp.le.f32.partialorder %v1387_v50, 0.7853982  ;;  %v1724_v7 = vor.u32 %v1723_v47, %v1722_v49  ;;  %v1727_v0 = vor.u32 %v1726_v37, %v1725_v2  ;;  %v1729_v31 = vshrl.u32 %v3085_v5, %v1714_v17 }
 0x1f8   : > { %v1453_v56 = vsub.s32 0, %v3973_v46  ;;  %v1747_v9 = vshll.u32 %v1707_v3, 8  ;;  %v1599_v33 = vshrl.u32 %v1598_v23, 23  ;;  %v2779_v39 = vadd.f32 %v3651_v48, %v3620_v32 }
 0x1f9   : > { %vm1587_vm13 = vcmp.eq.s32.totalorder %v3955_v8, 0  ;;  %v1730_v26 = vor.u32 %v1729_v31, %v1728_v24  ;;  %vm1731_vm14 = vcmp.lt.s32.totalorder %v3961_v60, 1  ;;  %vm1734_vm15 = vcmp.lt.s32.totalorder %v3961_v60, 4 }
 0x1fa   : > { %v2137_v50 = vmin.u32 %v1453_v56, %v3973_v46  ;;  %vm1586_vm0 = vcmp.lt.s32.totalorder %v3955_v8, 2  ;;  %v1474_v36 = vsel %vm1389_vm11, %v1473_v45, %v1449_v21  ;;  %v1715_v42 = vshrl.u32 %v3080_v10, %v1714_v17 }
 0x1fb   : > { %v1739_v34 = vsel %vm1731_vm14, %v1718_v41, %v1721_v12  ;;  %v1740_v48 = vsel %vm1734_vm15, %v1727_v0, 920167782  ;;  %vm1583_vm1 = vweird.f32 %v3640_v29  ;;  %vm1733_vm2 = vcmp.lt.s32.totalorder %v3961_v60, 3 }
 0x1fc   : > { %v1455_v40 = vclz %v2137_v50  ;;  %v1736_v4 = vsel %vm1734_vm15, %v1724_v7, 2102212464  ;;  %v1743_v30 = vsel %vm1731_vm14, %v1721_v12, %v1724_v7  ;;  %vm1732_vm3 = vcmp.lt.s32.totalorder %v3961_v60, 2 }
 0x1fd   : > { %v1741_v35 = vsel %vm1733_vm2, %v1724_v7, %v1740_v48  ;;  %v1744_v20 = vsel %vm1734_vm15, %v1730_v26, 1326507024  ;;  %v2144_v61 = vadd.s32 4294967169, %v1599_v33  ;;  %v1735_v63 = vsel %vm1731_vm14, %v1715_v42, %v1718_v41 }
 0x1fe   : > { %v2138_v55 = vadd.s32 4294967294, %v1455_v40  ;;  %v1742_v59 = vsel %vm1732_vm3, %v1739_v34, %v1741_v35  ;;  %v1745_v57 = vsel %vm1733_vm2, %v1727_v0, %v1744_v20  ;;  %v1737_v21 = vsel %vm1733_vm2, %v1721_v12, %v1736_v4 }
 0x1ff   : > { %v2923_v19 = vpop.eup %2922  ;;  %v1746_v3 = vsel %vm1732_vm3, %v1743_v30, %v1745_v57  ;;  %v4012_v17 = vmul.u32.u64.low %v1747_v9, %v1742_v59  ;;  %v4013_v28 = vmul.u32.u64.high %v1747_v9, %v1742_v59, %v4012_v17  ;;  %v1476_v15 = vsel %vm3980_vm9, 0, %v1474_v36 }
 0x200   : > { %v2925_v58 = vpop.eup %2924  ;;  %v1591_v23 = vxor.u32 2147483648, %v2923_v19  ;;  %vm2139_vm4 = vcmp.lt.s32.totalorder %v2138_v55, 0  ;;  %v4016_v18 = vmul.u32.u64.low %v1747_v9, %v1746_v3  ;;  %v4017_v53 = vmul.u32.u64.high %v1747_v9, %v1746_v3, %v4016_v18 }
 0x201   : > { %v1588_v22 = vxor.u32 2147483648, %v2925_v58  ;;  %v1458_v49 = vsel %vm2139_vm4, 0, %v2138_v55  ;;  %v1605_v6 = vadd.s32 1, %v2144_v61  ;;  %v1738_v45 = vsel %vm1732_vm3, %v1735_v63, %v1737_v21 }
 0x202   : > { %v1592_v47 = vsel %vm1590_vm12, %v1591_v23, %v2925_v58  ;;  %v1459_v2 = vsub.s32 32, %v1458_v49  ;;  %v1463_v37 = vsub.s32 4294967266, %v1458_v49  ;;  %v1757_v12 = vadd.s32 1, %v4013_v28 }
 0x203   : > { %v1589_v41 = vsel %vm1587_vm13, %v2923_v19, %v1588_v22  ;;  %vm1606_vm5 = vcmp.gt.s32.totalorder %v1605_v6, 0  ;;  %v4029_v24 = vadd.f32 %v2779_v39, %v3653_v16  ;;  %v1460_v7 = vshll.u32 %v3973_v46, %v1458_v49 }
 0x204   : > { %v1593_v56 = vsel %vm1586_vm0, %v1589_v41, %v1592_v47  ;;  %v1461_v0 = vshrl.u32 %v1443_v54, %v1459_v2  ;;  %v1464_v31 = vadd.s32 127, %v1463_v37  ;;  %v1754_v33 = vmul.u32 %v1747_v9, %v1738_v45 }
 0x205   : > { %v1594_v60 = vsel %vm1583_vm1, nan, %v1593_v56  ;;  %vm1756_vm6 = vc.u32 %v4017_v53, %v4012_v17  ;;  %v1607_v50 = vsel %vm1606_vm5, %v1605_v6, 0  ;;  %v1480_v34 = vadd.s32 3, %v1476_v15 }
 0x206   : > { %2014 = vst [vmem:[%s3919_s8 + $0x18] sm:$0xff] %v1594_v60  ;;  %v1462_v26 = vor.u32 %v1461_v0, %v1460_v7  ;;  %v1465_v36 = vshll.u32 %v1464_v31, 23  ;;  %v1758_v16 = vsel %vm1756_vm6, %v1757_v12, %v4013_v28  ;;  %v1609_v8 = vand.u32 31, %v1607_v50 }
 0x207   : > { %v1759_v39 = vadd.s32 %v1758_v16, %v1754_v33  ;;  %v1602_v46 = vand.u32 8388607, %v1595_v51  ;;  %v4042_v48 = vshrl.u32 %v1607_v50, 5  ;;  %v4057_v15 = vand.u32 3, %v1480_v34 }
 0x208   : > { %v1466_v42 = vor.u32 4788187, %v1465_v36  ;;  %v1469_v54 = vcvt.s32.f32 %v1462_v26  ;;  %v1610_v9 = vsub.s32 32, %v1609_v8  ;;  %v1612_v4 = vshll.u32 %v3080_v10, %v1609_v8 }
 0x209   : > { %v1760_v29 = vadd.s32 536870912, %v1759_v39  ;;  %v1615_v30 = vshll.u32 %v3081_v44, %v1609_v8  ;;  %v1618_v35 = vshll.u32 %v3082_v52, %v1609_v8  ;;  %v1621_v63 = vshll.u32 %v3083_v1, %v1609_v8 }
 0x20a   : > { %v1467_v40 = vand.u32 2147483647, %v1466_v42  ;;  %v1613_v61 = vshrl.u32 %v3081_v44, %v1610_v9  ;;  %v1616_v55 = vshrl.u32 %v3082_v52, %v1610_v9  ;;  %v1619_v57 = vshrl.u32 %v3083_v1, %v1610_v9 }
 0x20b   : > { %v4047_v20 = vshrl.u32 %v1760_v29, 30  ;;  %v1622_v19 = vshrl.u32 %v3084_v11, %v1610_v9  ;;  %v1625_v21 = vshrl.u32 %v3085_v5, %v1610_v9  ;;  %v1624_v58 = vshll.u32 %v3084_v11, %v1609_v8 }
 0x20c   : > { %v1470_v59 = vmul.f32 %v1469_v54, %v1467_v40  ;;  %v1614_v28 = vor.u32 %v1613_v61, %v1612_v4  ;;  %v1617_v18 = vor.u32 %v1616_v55, %v1615_v30  ;;  %v1620_v22 = vor.u32 %v1619_v57, %v1618_v35 }
 0x20d   : > { %v1762_v3 = vshll.u32 %v4047_v20, 30  ;;  %v1623_v49 = vor.u32 %v1622_v19, %v1621_v63  ;;  %v1603_v47 = vor.u32 8388608, %v1602_v46  ;;  %v2781_v2 = vadd.f32 %v3620_v32, %v3655_v14 }
 0x20e   : > { %v1471_v23 = vxor.u32 2147483648, %v1470_v59  ;;  %v1626_v45 = vor.u32 %v1625_v21, %v1624_v58  ;;  %vm1627_vm7 = vcmp.lt.s32.totalorder %v4042_v48, 1  ;;  %vm1628_vm8 = vcmp.lt.s32.totalorder %v4042_v48, 2 }
 0x20f   : > { %v4059_v6 = vsub.s32 %v1759_v39, %v1762_v3  ;;  %vm1629_vm10 = vcmp.lt.s32.totalorder %v4042_v48, 3  ;;  %vm1630_vm12 = vcmp.lt.s32.totalorder %v4042_v48, 4  ;;  %v1635_v14 = vsel %vm1627_vm7, %v1614_v28, %v1617_v18 }
 0x210   : > { %v1472_v37 = vsel %vm1389_vm11, %v1471_v23, %v1470_v59  ;;  %v1632_v32 = vsel %vm1630_vm12, %v1620_v22, 2102212464  ;;  %v1636_v56 = vsel %vm1630_vm12, %v1623_v49, 920167782  ;;  %v1611_v0 = vshrl.u32 %v3080_v10, %v1610_v9 }
 0x211   : > { %v1475_v41 = vsel %vm3980_vm9, %v3646_v27, %v1472_v37  ;;  %v1765_v12 = vsub.s32 0, %v4059_v6  ;;  %v1637_v43 = vsel %vm1629_vm10, %v1620_v22, %v1636_v56  ;;  %v1639_v60 = vsel %vm1627_vm7, %v1617_v18, %v1620_v22 }
 0x212   : > { %2926 = vcosq.f32 %v1475_v41  ;;  %v1638_v31 = vsel %vm1628_vm8, %v1635_v14, %v1637_v43  ;;  %v1640_v33 = vsel %vm1630_vm12, %v1626_v45, 1326507024  ;;  %v1643_v50 = vshll.u32 %v1603_v47, 8 }
 0x213   : > { %2928 = vsinq.f32 %v1475_v41  ;;  %v2149_v7 = vmin.u32 %v1765_v12, %v4059_v6  ;;  %vm1701_vm11 = vcmp.lt.s32.totalorder %v3820_v25, 0  ;;  %v1631_v36 = vsel %vm1627_vm7, %v1611_v0, %v1614_v28 }
 0x214   : > { %v1633_v16 = vsel %vm1629_vm10, %v1617_v18, %v1632_v32  ;;  %v1641_v39 = vsel %vm1629_vm10, %v1623_v49, %v1640_v33  ;;  %v4090_v8 = vmul.u32.u64.low %v1643_v50, %v1638_v31  ;;  %v4091_v42 = vmul.u32.u64.high %v1643_v50, %v1638_v31, %v4090_v8 }
 0x215   : > { %v1767_v26 = vclz %v2149_v7  ;;  %v1910_v34 = vand.u32 2139095040, %v4029_v24  ;;  %vm4097_vm9 = vcmp.le.f32.partialorder %v1699_v38, 0.7853982  ;;  %v1785_v29 = vsub.s32 4, %v4047_v20 }
 0x216   : > { %v1642_v9 = vsel %vm1628_vm8, %v1639_v60, %v1641_v39  ;;  %vm1482_vm13 = vcmp.lt.s32.totalorder %v4057_v15, 2  ;;  %v4109_v35 = vadd.f32 %v2781_v2, %v3657_v62  ;;  %vm1483_vm14 = vcmp.eq.s32.totalorder %v4057_v15, 0 }
 0x217   : > { %v2150_v54 = vadd.s32 4294967294, %v1767_v26  ;;  %v4105_v40 = vmul.u32.u64.low %v1643_v50, %v1642_v9  ;;  %v4106_v4 = vmul.u32.u64.high %v1643_v50, %v1642_v9, %v4105_v40  ;;  %v1911_v30 = vshrl.u32 %v1910_v34, 23 }
 0x218   : > { %vm1486_vm15 = vcmp.eq.s32.totalorder %v4057_v15, 2  ;;  %v1634_v38 = vsel %vm1628_vm8, %v1631_v36, %v1633_v16  ;;  %v1755_v61 = vadd.s32 %v4012_v17, %v4017_v53  ;;  %v1653_v63 = vadd.s32 1, %v4091_v42 }
 0x219   : > { %vm2151_vm0 = vcmp.lt.s32.totalorder %v2150_v54, 0  ;;  %v2156_v59 = vadd.s32 4294967169, %v1911_v30  ;;  %v1786_v62 = vsel %vm1701_vm11, %v1785_v29, %v4047_v20  ;;  %v1907_v21 = vand.u32 2147483647, %v4029_v24 }
 0x21a   : > { %v1770_v55 = vsel %vm2151_vm0, 0, %v2150_v54  ;;  %v1650_v48 = vmul.u32 %v1643_v50, %v1634_v38  ;;  %vm1652_vm1 = vc.u32 %v4106_v4, %v4090_v8  ;;  %v1788_v20 = vsel %vm4097_vm9, 0, %v1786_v62 }
 0x21b   : > { %v1771_v57 = vsub.s32 32, %v1770_v55  ;;  %v1775_v19 = vsub.s32 4294967266, %v1770_v55  ;;  %v1772_v28 = vshll.u32 %v4059_v6, %v1770_v55  ;;  %v1917_v17 = vadd.s32 1, %v2156_v59 }
 0x21c   : > { %v2927_v3 = vpop.eup %2926  ;;  %v1654_v22 = vsel %vm1652_vm1, %v1653_v63, %v4091_v42  ;;  %v1914_v32 = vand.u32 8388607, %v1907_v21  ;;  %vm1479_vm3 = vweird.f32 %v3646_v27  ;;  %v1792_v43 = vadd.s32 3, %v1788_v20 }
 0x21d   : > { %v2929_v53 = vpop.eup %2928  ;;  %v1487_v58 = vxor.u32 2147483648, %v2927_v3  ;;  %v1773_v23 = vshrl.u32 %v1755_v61, %v1771_v57  ;;  %v1776_v18 = vadd.s32 127, %v1775_v19  ;;  %v1655_v47 = vadd.s32 %v1654_v22, %v1650_v48 }
 0x21e   : > { %v1484_v49 = vxor.u32 2147483648, %v2929_v53  ;;  %vm1918_vm2 = vcmp.gt.s32.totalorder %v1917_v17, 0  ;;  %v1915_v36 = vor.u32 8388608, %v1914_v32  ;;  %v4146_v54 = vand.u32 3, %v1792_v43 }
 0x21f   : > { %v1488_v6 = vsel %vm1486_vm15, %v1487_v58, %v2929_v53  ;;  %v1774_v2 = vor.u32 %v1773_v23, %v1772_v28  ;;  %v1777_v37 = vshll.u32 %v1776_v18, 23  ;;  %v1919_v45 = vsel %vm1918_vm2, %v1917_v17, 0 }
 0x220   : > { %v1485_v41 = vsel %vm1483_vm14, %v2927_v3, %v1484_v49  ;;  %v1656_v12 = vadd.s32 536870912, %v1655_v47  ;;  %v1921_v14 = vand.u32 31, %v1919_v45  ;;  %v1920_v9 = vshrl.u32 %v1919_v45, 5 }
 0x221   : > { %v1489_v56 = vsel %vm1482_vm13, %v1485_v41, %v1488_v6  ;;  %v1778_v7 = vor.u32 4788187, %v1777_v37  ;;  %v1781_v50 = vcvt.s32.f32 %v1774_v2  ;;  %v1955_v48 = vshll.u32 %v1915_v36, 8 }
 0x222   : > { %v1490_v0 = vsel %vm1479_vm3, nan, %v1489_v56  ;;  %v4137_v31 = vshrl.u32 %v1656_v12, 30  ;;  %v1922_v60 = vsub.s32 32, %v1921_v14  ;;  %v1924_v16 = vshll.u32 %v3080_v10, %v1921_v14 }
 0x223   : > { %2013 = vst [vmem:[%s3919_s8 + $0x10] sm:$0xff] %v1490_v0  ;;  %v1779_v33 = vand.u32 2147483647, %v1778_v7  ;;  %v1927_v40 = vshll.u32 %v3081_v44, %v1921_v14  ;;  %v1930_v61 = vshll.u32 %v3082_v52, %v1921_v14  ;;  %v1933_v55 = vshll.u32 %v3083_v1, %v1921_v14 }
 0x224   : > { %v1658_v26 = vshll.u32 %v4137_v31, 30  ;;  %v1925_v39 = vshrl.u32 %v3081_v44, %v1922_v60  ;;  %v1928_v15 = vshrl.u32 %v3082_v52, %v1922_v60  ;;  %v1931_v42 = vshrl.u32 %v3083_v1, %v1922_v60 }
 0x225   : > { %v1782_v27 = vmul.f32 %v1781_v50, %v1779_v33  ;;  %v1934_v34 = vshrl.u32 %v3084_v11, %v1922_v60  ;;  %v1936_v57 = vshll.u32 %v3084_v11, %v1921_v14  ;;  %v1937_v19 = vshrl.u32 %v3085_v5, %v1922_v60 }
 0x226   : > { %v4148_v29 = vsub.s32 %v1655_v47, %v1658_v26  ;;  %v1926_v38 = vor.u32 %v1925_v39, %v1924_v16  ;;  %v1929_v59 = vor.u32 %v1928_v15, %v1927_v40  ;;  %v1932_v3 = vor.u32 %v1931_v42, %v1930_v61 }
 0x227   : > { %v1783_v30 = vxor.u32 2147483648, %v1782_v27  ;;  %v1935_v28 = vor.u32 %v1934_v34, %v1933_v55  ;;  %v1938_v58 = vor.u32 %v1937_v19, %v1936_v57  ;;  %v1806_v23 = vand.u32 2139095040, %v4109_v35 }
 0x228   : > { %v1661_v63 = vsub.s32 0, %v4148_v29  ;;  %v1923_v18 = vshrl.u32 %v3080_v10, %v1922_v60  ;;  %vm1939_vm4 = vcmp.lt.s32.totalorder %v1920_v9, 1  ;;  %vm1940_vm5 = vcmp.lt.s32.totalorder %v1920_v9, 2 }
 0x229   : > { %v1784_v62 = vsel %vm1701_vm11, %v1783_v30, %v1782_v27  ;;  %vm1942_vm6 = vcmp.lt.s32.totalorder %v1920_v9, 4  ;;  %v1947_v49 = vsel %vm1939_vm4, %v1926_v38, %v1929_v59  ;;  %vm1941_vm7 = vcmp.lt.s32.totalorder %v1920_v9, 3 }
 0x22a   : > { %v1787_v17 = vsel %vm4097_vm9, %v3820_v25, %v1784_v62  ;;  %v2145_v53 = vmin.u32 %v1661_v63, %v4148_v29  ;;  %v1944_v20 = vsel %vm1942_vm6, %v1932_v3, 2102212464  ;;  %v1948_v47 = vsel %vm1942_vm6, %v1935_v28, 920167782 }
 0x22b   : > { %2930 = vcosq.f32 %v1787_v17  ;;  %v1951_v6 = vsel %vm1939_vm4, %v1929_v59, %v1932_v3  ;;  %v1943_v2 = vsel %vm1939_vm4, %v1923_v18, %v1926_v38  ;;  %v1949_v37 = vsel %vm1941_vm7, %v1932_v3, %v1948_v47 }
 0x22c   : > { %2932 = vsinq.f32 %v1787_v17  ;;  %v1663_v22 = vclz %v2145_v53  ;;  %v1952_v45 = vsel %vm1942_vm6, %v1938_v58, 1326507024  ;;  %v1945_v41 = vsel %vm1941_vm7, %v1929_v59, %v1944_v20 }
 0x22d   : > { %v1950_v12 = vsel %vm1940_vm5, %v1947_v49, %v1949_v37  ;;  %v1953_v32 = vsel %vm1941_vm7, %v1935_v28, %v1952_v45  ;;  %v1807_v14 = vshrl.u32 %v1806_v23, 23  ;;  %v1651_v43 = vadd.s32 %v4090_v8, %v4106_v4 }
 0x22e   : > { %v2146_v46 = vadd.s32 4294967294, %v1663_v22  ;;  %v1954_v56 = vsel %vm1940_vm5, %v1951_v6, %v1953_v32  ;;  %v4166_v7 = vmul.u32.u64.low %v1955_v48, %v1950_v12  ;;  %v4167_v0 = vmul.u32.u64.high %v1955_v48, %v1950_v12, %v4166_v7 }
 0x22f   : > { %v4172_v33 = vmul.u32.u64.low %v1955_v48, %v1954_v56  ;;  %v4173_v50 = vmul.u32.u64.high %v1955_v48, %v1954_v56, %v4172_v33  ;;  %v1946_v16 = vsel %vm1940_vm5, %v1943_v2, %v1945_v41  ;;  %v2152_v39 = vadd.s32 4294967169, %v1807_v14 }
 0x230   : > { %vm2147_vm8 = vcmp.lt.s32.totalorder %v2146_v46, 0  ;;  %vm1791_vm10 = vweird.f32 %v3820_v25  ;;  %vm1597_vm12 = vcmp.lt.s32.totalorder %v3824_v13, 0  ;;  %v1965_v34 = vadd.s32 1, %v4167_v0 }
 0x231   : > { %v1666_v60 = vsel %vm2147_vm8, 0, %v2146_v46  ;;  %v1813_v8 = vadd.s32 1, %v2152_v39  ;;  %vm1798_vm11 = vcmp.eq.s32.totalorder %v4146_v54, 2  ;;  %v1681_v40 = vsub.s32 4, %v4137_v31 }
 0x232   : > { %v1667_v26 = vsub.s32 32, %v1666_v60  ;;  %v1671_v36 = vsub.s32 4294967266, %v1666_v60  ;;  %v1668_v27 = vshll.u32 %v4148_v29, %v1666_v60  ;;  %v1962_v30 = vmul.u32 %v1955_v48, %v1946_v16 }
 0x233   : > { %vm1964_vm9 = vc.u32 %v4173_v50, %v4166_v7  ;;  %v1803_v57 = vand.u32 2147483647, %v4109_v35  ;;  %vm1814_vm13 = vcmp.gt.s32.totalorder %v1813_v8, 0  ;;  %vm1795_vm14 = vcmp.eq.s32.totalorder %v4146_v54, 0 }
 0x234   : > { %v1669_v15 = vshrl.u32 %v1651_v43, %v1667_v26  ;;  %v1672_v42 = vadd.s32 127, %v1671_v36  ;;  %v1966_v29 = vsel %vm1964_vm9, %v1965_v34, %v4167_v0  ;;  %v1815_v3 = vsel %vm1814_vm13, %v1813_v8, 0 }
 0x235   : > { %v2931_v4 = vpop.eup %2930  ;;  %v1967_v59 = vadd.s32 %v1966_v29, %v1962_v30  ;;  %vm1794_vm15 = vcmp.lt.s32.totalorder %v4146_v54, 2  ;;  %v1817_v17 = vand.u32 31, %v1815_v3  ;;  %v1682_v18 = vsel %vm1597_vm12, %v1681_v40, %v4137_v31 }
 0x236   : > { %v2933_v9 = vpop.eup %2932  ;;  %v1799_v38 = vxor.u32 2147483648, %v2931_v4  ;;  %v1670_v61 = vor.u32 %v1669_v15, %v1668_v27  ;;  %v1673_v55 = vshll.u32 %v1672_v42, 23  ;;  %v1810_v20 = vand.u32 8388607, %v1803_v57 }
 0x237   : > { %v1796_v63 = vxor.u32 2147483648, %v2933_v9  ;;  %v1968_v48 = vadd.s32 536870912, %v1967_v59  ;;  %v1818_v47 = vsub.s32 32, %v1817_v17  ;;  %vm4200_vm0 = vcmp.le.f32.partialorder %v1595_v51, 0.7853982 }
 0x238   : > { %v1800_v19 = vsel %vm1798_vm11, %v1799_v38, %v2933_v9  ;;  %v1674_v62 = vor.u32 4788187, %v1673_v55  ;;  %v1677_v23 = vcvt.s32.f32 %v1670_v61  ;;  %v1684_v31 = vsel %vm4200_vm0, 0, %v1682_v18 }
 0x239   : > { %v1797_v28 = vsel %vm1795_vm14, %v2931_v4, %v1796_v63  ;;  %v4193_v49 = vshrl.u32 %v1968_v48, 30  ;;  %v1820_v46 = vshll.u32 %v3080_v10, %v1817_v17  ;;  %v1821_v2 = vshrl.u32 %v3081_v44, %v1818_v47 }
 0x23a   : > { %v1801_v53 = vsel %vm1794_vm15, %v1797_v28, %v1800_v19  ;;  %v1675_v58 = vand.u32 2147483647, %v1674_v62  ;;  %v1824_v45 = vshrl.u32 %v3082_v52, %v1818_v47  ;;  %v1827_v41 = vshrl.u32 %v3083_v1, %v1818_v47 }
 0x23b   : > { %v1802_v22 = vsel %vm1791_vm10, nan, %v1801_v53  ;;  %v1970_v25 = vshll.u32 %v4193_v49, 30  ;;  %v1830_v51 = vshrl.u32 %v3084_v11, %v1818_v47  ;;  %v1811_v32 = vor.u32 8388608, %v1810_v20 }
 0x23c   : > { %2016 = vst [vmem:[%s3919_s8 + $0x28] sm:$0xff] %v1802_v22  ;;  %v1678_v6 = vmul.f32 %v1677_v23, %v1675_v58  ;;  %v1816_v14 = vshrl.u32 %v1815_v3, 5  ;;  %v1823_v56 = vshll.u32 %v3081_v44, %v1817_v17  ;;  %v1822_v43 = vor.u32 %v1821_v2, %v1820_v46 }
 0x23d   : > { %v4212_v12 = vsub.s32 %v1967_v59, %v1970_v25  ;;  %v1826_v60 = vshll.u32 %v3082_v52, %v1817_v17  ;;  %v1829_v33 = vshll.u32 %v3083_v1, %v1817_v17  ;;  %v1832_v39 = vshll.u32 %v3084_v11, %v1817_v17 }
 0x23e   : > { %v1679_v37 = vxor.u32 2147483648, %v1678_v6  ;;  %v1825_v16 = vor.u32 %v1824_v45, %v1823_v56  ;;  %v1833_v15 = vshrl.u32 %v3085_v5, %v1818_v47  ;;  %v1688_v42 = vadd.s32 3, %v1684_v31 }
 0x23f   : > { %v1973_v36 = vsub.s32 0, %v4212_v12  ;;  %v1828_v27 = vor.u32 %v1827_v41, %v1826_v60  ;;  %v1831_v44 = vor.u32 %v1830_v51, %v1829_v33  ;;  %v1819_v1 = vshrl.u32 %v3080_v10, %v1818_v47 }
 0x240   : > { %v1680_v0 = vsel %vm1597_vm12, %v1679_v37, %v1678_v6  ;;  %v1834_v34 = vor.u32 %v1833_v15, %v1832_v39  ;;  %vm1835_vm1 = vcmp.lt.s32.totalorder %v1816_v14, 1  ;;  %v1851_v8 = vshll.u32 %v1811_v32, 8 }
 0x241   : > { %v1683_v26 = vsel %vm4200_vm0, %v3824_v13, %v1680_v0  ;;  %v2157_v52 = vmin.u32 %v1973_v36, %v4212_v12  ;;  %vm1837_vm2 = vcmp.lt.s32.totalorder %v1816_v14, 3  ;;  %vm1838_vm3 = vcmp.lt.s32.totalorder %v1816_v14, 4 }
 0x242   : > { %2934 = vcosq.f32 %v1683_v26  ;;  %v1843_v40 = vsel %vm1835_vm1, %v1822_v43, %v1825_v16  ;;  %v1840_v30 = vsel %vm1838_vm3, %v1828_v27, 2102212464  ;;  %v1844_v11 = vsel %vm1838_vm3, %v1831_v44, 920167782 }
 0x243   : > { %2936 = vsinq.f32 %v1683_v26  ;;  %v1975_v4 = vclz %v2157_v52  ;;  %v1847_v9 = vsel %vm1835_vm1, %v1825_v16, %v1828_v27  ;;  %v1848_v38 = vsel %vm1838_vm3, %v1834_v34, 1326507024 }
 0x244   : > { %vm1836_vm4 = vcmp.lt.s32.totalorder %v1816_v14, 2  ;;  %v1845_v5 = vsel %vm1837_vm2, %v1828_v27, %v1844_v11  ;;  %v1849_v55 = vsel %vm1837_vm2, %v1831_v44, %v1848_v38  ;;  %v1689_v29 = vand.u32 3, %v1688_v42 }
 0x245   : > { %v2158_v61 = vadd.s32 4294967294, %v1975_v4  ;;  %v1839_v63 = vsel %vm1835_vm1, %v1819_v1, %v1822_v43  ;;  %v1846_v10 = vsel %vm1836_vm4, %v1843_v40, %v1845_v5  ;;  %v1850_v59 = vsel %vm1836_vm4, %v1847_v9, %v1849_v55 }
 0x246   : > { %v1841_v19 = vsel %vm1837_vm2, %v1825_v16, %v1840_v30  ;;  %v4232_v62 = vmul.u32.u64.low %v1851_v8, %v1850_v59  ;;  %v4233_v3 = vmul.u32.u64.high %v1851_v8, %v1850_v59, %v4232_v62  ;;  %v1963_v53 = vadd.s32 %v4166_v7, %v4173_v50 }
 0x247   : > { %vm2159_vm5 = vcmp.lt.s32.totalorder %v2158_v61, 0  ;;  %v4235_v48 = vmul.u32.u64.low %v1851_v8, %v1846_v10  ;;  %v4236_v17 = vmul.u32.u64.high %v1851_v8, %v1846_v10, %v4235_v48  ;;  %vm1691_vm6 = vcmp.eq.s32.totalorder %v1689_v29, 0 }
 0x248   : > { %v1978_v28 = vsel %vm2159_vm5, 0, %v2158_v61  ;;  %v1842_v22 = vsel %vm1836_vm4, %v1839_v63, %v1841_v19  ;;  %vm1694_vm7 = vcmp.eq.s32.totalorder %v1689_v29, 2  ;;  %vm1690_vm10 = vcmp.lt.s32.totalorder %v1689_v29, 2 }
 0x249   : > { %v1979_v58 = vsub.s32 32, %v1978_v28  ;;  %v1983_v23 = vsub.s32 4294967266, %v1978_v28  ;;  %v1980_v54 = vshll.u32 %v4212_v12, %v1978_v28  ;;  %vm1860_vm8 = vc.u32 %v4233_v3, %v4235_v48 }
 0x24a   : > { %v1861_v46 = vadd.s32 1, %v4236_v17  ;;  %v1858_v37 = vmul.u32 %v1851_v8, %v1842_v22  ;;  %vm1687_vm12 = vweird.f32 %v3824_v13  ;;  %v1993_v60 = vsub.s32 4, %v4193_v49 }
 0x24b   : > { %v1981_v6 = vshrl.u32 %v1963_v53, %v1979_v58  ;;  %v1984_v31 = vadd.s32 127, %v1983_v23  ;;  %vm1909_vm11 = vcmp.lt.s32.totalorder %v4029_v24, 0  ;;  %vm1908_vm9 = vcmp.le.f32.partialorder %v1907_v21, 0.7853982 }
 0x24c   : > { %v2935_v18 = vpop.eup %2934  ;;  %v1862_v41 = vsel %vm1860_vm8, %v1861_v46, %v4236_v17  ;;  %v1994_v39 = vsel %vm1909_vm11, %v1993_v60, %v4193_v49  ;;  %v1859_v49 = vadd.s32 %v4235_v48, %v4233_v3  ;;  %vm1999_vm1 = vweird.f32 %v4029_v24 }
 0x24d   : > { %v2937_v20 = vpop.eup %2936  ;;  %v1695_v47 = vxor.u32 2147483648, %v2935_v18  ;;  %v1982_v50 = vor.u32 %v1981_v6, %v1980_v54  ;;  %v1985_v2 = vshll.u32 %v1984_v31, 23  ;;  %v1863_v32 = vadd.s32 %v1862_v41, %v1858_v37 }
 0x24e   : > { %v1692_v25 = vxor.u32 2147483648, %v2937_v20  ;;  %v1996_v15 = vsel %vm1908_vm9, 0, %v1994_v39  ;;  %vm1805_vm2 = vcmp.lt.s32.totalorder %v4109_v35, 0  ;;  %vm1804_vm3 = vcmp.le.f32.partialorder %v1803_v57, 0.7853982 }
 0x24f   : > { %v1696_v7 = vsel %vm1694_vm7, %v1695_v47, %v2937_v20  ;;  %v1986_v12 = vor.u32 4788187, %v1985_v2  ;;  %v1989_v0 = vcvt.s32.f32 %v1982_v50  ;;  %v1864_v43 = vadd.s32 536870912, %v1863_v32 }
 0x250   : > { %v1693_v45 = vsel %vm1691_vm6, %v2935_v18, %v1692_v25  ;;  %v2000_v1 = vadd.s32 3, %v1996_v15  ;;  %vm1895_vm7 = vweird.f32 %v4109_v35 }
 0x251   : > { %v1697_v51 = vsel %vm1690_vm10, %v1693_v45, %v1696_v7  ;;  %v1987_v56 = vand.u32 2147483647, %v1986_v12  ;;  %v1865_v26 = vshrl.u32 %v1864_v43, 30 }
 0x252   : > { %v1698_v14 = vsel %vm1687_vm12, nan, %v1697_v51  ;;  %v2001_v4 = vand.u32 3, %v2000_v1 }
 0x253   : > { %2015 = vst [vmem:[%s3919_s8 + $0x20] sm:$0xff] %v1698_v14  ;;  %v1990_v33 = vmul.f32 %v1989_v0, %v1987_v56  ;;  %v1866_v16 = vshll.u32 %v1865_v26, 30  ;;  %v1889_v58 = vsub.s32 4, %v1865_v26 }
 0x254   : > { %vm2006_vm14 = vcmp.eq.s32.totalorder %v2001_v4, 2  ;;  %vm2003_vm15 = vcmp.eq.s32.totalorder %v2001_v4, 0  ;;  %vm2002_vm0 = vcmp.lt.s32.totalorder %v2001_v4, 2 }
 0x255   : > { %v1991_v36 = vxor.u32 2147483648, %v1990_v33  ;;  %v1867_v27 = vsub.s32 %v1863_v32, %v1866_v16  ;;  %v1890_v22 = vsel %vm1805_vm2, %v1889_v58, %v1865_v26 }
 0x256   : > { %v1892_v20 = vsel %vm1804_vm3, 0, %v1890_v22 }
 0x257   : > { %v1992_v13 = vsel %vm1909_vm11, %v1991_v36, %v1990_v33  ;;  %v1869_v42 = vsub.s32 0, %v1867_v27  ;;  %v1896_v47 = vadd.s32 3, %v1892_v20 }
 0x258   : > { %v1995_v44 = vsel %vm1908_vm9, %v4029_v24, %v1992_v13 }
 0x259   : > { %2938 = vcosq.f32 %v1995_v44  ;;  %v2153_v52 = vmin.u32 %v1869_v42, %v1867_v27  ;;  %v1897_v54 = vand.u32 3, %v1896_v47 }
 0x25a   : > { %2940 = vsinq.f32 %v1995_v44 }
 0x25b   : > { %v1871_v34 = vclz %v2153_v52  ;;  %vm1902_vm4 = vcmp.eq.s32.totalorder %v1897_v54, 2  ;;  %vm1899_vm5 = vcmp.eq.s32.totalorder %v1897_v54, 0  ;;  %vm1898_vm6 = vcmp.lt.s32.totalorder %v1897_v54, 2 }
 0x25d   : > { %v2154_v8 = vadd.s32 4294967294, %v1871_v34 }
 0x25f   : > { %vm2155_vm13 = vcmp.lt.s32.totalorder %v2154_v8, 0 }
 0x260   : > { %v1874_v40 = vsel %vm2155_vm13, 0, %v2154_v8 }
 0x261   : > { %v1875_v11 = vsub.s32 32, %v1874_v40  ;;  %v1879_v21 = vsub.s32 4294967266, %v1874_v40  ;;  %v1876_v5 = vshll.u32 %v1867_v27, %v1874_v40 }
 0x263   : > { %v2939_v30 = vpop.eup %2938  ;;  %v1877_v55 = vshrl.u32 %v1859_v49, %v1875_v11  ;;  %v1880_v29 = vadd.s32 127, %v1879_v21 }
 0x264   : > { %v2941_v9 = vpop.eup %2940  ;;  %v2007_v38 = vxor.u32 2147483648, %v2939_v30 }
 0x265   : > { %v2004_v61 = vxor.u32 2147483648, %v2941_v9  ;;  %v1878_v59 = vor.u32 %v1877_v55, %v1876_v5  ;;  %v1881_v19 = vshll.u32 %v1880_v29, 23 }
 0x266   : > { %v2008_v63 = vsel %vm2006_vm14, %v2007_v38, %v2941_v9 }
 0x267   : > { %v2005_v10 = vsel %vm2003_vm15, %v2939_v30, %v2004_v61  ;;  %v1882_v28 = vor.u32 4788187, %v1881_v19  ;;  %v1885_v17 = vcvt.s32.f32 %v1878_v59 }
 0x268   : > { %v2009_v62 = vsel %vm2002_vm0, %v2005_v10, %v2008_v63 }
 0x269   : > { %v2010_v3 = vsel %vm1999_vm1, nan, %v2009_v62  ;;  %v1883_v48 = vand.u32 2147483647, %v1882_v28 }
 0x26a   : > { %2018 = vst [vmem:[%s3919_s8 + $0x38] sm:$0xff] %v2010_v3 }
 0x26b   : > { %v1886_v53 = vmul.f32 %v1885_v17, %v1883_v48 }
 0x26d   : > { %v1887_v23 = vxor.u32 2147483648, %v1886_v53 }
 0x26f   : > { %v1888_v18 = vsel %vm1805_vm2, %v1887_v23, %v1886_v53 }
 0x270   : > { %v1891_v24 = vsel %vm1804_vm3, %v4109_v35, %v1888_v18 }
 0x271   : > { %2942 = vcosq.f32 %v1891_v24 }
 0x272   : > { %2944 = vsinq.f32 %v1891_v24 }
 0x27b   : > { %v2943_v6 = vpop.eup %2942 }
 0x27c   : > { %v2945_v31 = vpop.eup %2944  ;;  %v1903_v25 = vxor.u32 2147483648, %v2943_v6 }
 0x27d   : > { %v1900_v46 = vxor.u32 2147483648, %v2945_v31 }
 0x27e   : > { %v1904_v57 = vsel %vm1902_vm4, %v1903_v25, %v2945_v31 }
 0x27f   : > { %v1901_v7 = vsel %vm1899_vm5, %v2943_v6, %v1900_v46 }
 0x280   : > { %v1905_v50 = vsel %vm1898_vm6, %v1901_v7, %v1904_v57 }
 0x281   : > { %v1906_v2 = vsel %vm1895_vm7, nan, %v1905_v50 }
 0x282   : > { %2017 = vst [vmem:[%s3919_s8 + $0x30] sm:$0xff] %v1906_v2 }
 0x283   : > { %3017 = shalt.err (!%p3014_p7)
}
 0x284   : > { %s3018_s30 = scalar_lea.hbm %s4266_s11, 1024  ;;  %s3022_s10 = scalar_lea.hbm %s4316_s3, 4096 }
 0x285   : > { %p3019_p9 = scmp.ne.s32.totalorder %s4266_s11, %s3018_s30  ;;  %p3023_p5 = scmp.lt.u32.totalorder %s4266_s11, %s4316_s3 }
 0x286   : > { %p3024_p10 = scmp.lt.u32.totalorder %s3022_s10, %s3018_s30  ;;  %p3026_p4 = scmp.lt.u32.totalorder %s3018_s30, %s4266_s11 }
 0x287   : > { %p3020_p1 = pnand %p3019_p9, %p3195_p12 }
 0x288   : > { %p3025_p2 = por %p3024_p10, %p3023_p5 }
 0x289   : > { %p3021_p0 = pneg %p3020_p1 }
 0x28a   : > { %p3027_p6 = por %p3026_p4, %p3025_p2 }
 0x28c   : > { %p3028_p8 = pnand %p3027_p6, %p3021_p0 }
 0x28e   : > { %3031 = shalt.err (!%p3028_p8)
}
 0x28f   : > { %s3087_s20 = smov 128   ;;  %s3088_s8 = smov 8  }
 0x290   : > { %2853 = dma.vmem_to_hbm [thread:$0]  (%p3195_p12), %s4268_s4, 1024, %s4266_s11, %s2020_s16, %s3087_s20, %s3087_s20, %s3088_s8  }
 0x291 PF: > { %p2870_p11 = scmp.ge.s32.totalorder %s3074_s15, 2  ;;  %s2048_s9 = sand.u32 1, %s3062_s12  }
 0x292   : > { %p4388_p13 = scmp.ne.s32.totalorder %s4340_s19, 0  ;;  %s2049_s25 = scalar_lea.sflag [#allocation4], %s2048_s9 }
 0x294   : > { %p2864_p3 = pnand %p2870_p11, %p4388_p13 }
 0x296   : > { %3057 = dma.done.wait (!%p2864_p3), %s2049_s25, 1024  }
 0x297   : > { %3059 = vsyncadd (!%p2864_p3), %s2049_s25, 4294966272  ;;  %p17_p7 = scmp.ge.s32.totalorder %s3162_s24, 6   ;;  %s4389_s12 = smov %s3066_s13 }
 0x298   : > { %s4390_s13 = smov %s3070_s14  ;;  %s4391_s14 = smov %s3191_s17 }
 0x299   : > { %s4392_s15 = smov %s3162_s24  ;;  %19 = sbr.rel (!%p17_p7) target bundleno = 6 (0x6), region = 81 }
 0x2a0   :  { %2054 = vsyncpa [#allocation3], 1 }
 0x2a1   :  { %2056 = vsyncpa [#allocation3 + $0x1], 1 }
 0x2a2   :  { %2057 = vsyncpa [#allocation6], 1 }
 0x2a3   :  { %2058 = vsyncpa [#allocation4], 1 }
 0x2a4   :  { %2060 = vsyncpa [#allocation4 + $0x1], 1 }

</bundles_post_ra>
